<compile_context>
chip_gen: v7x
topology: tpu7x:2x2x1
jax: 0.10.0
libtpu: 0.0.40
codegen_flags: <defaults>
</compile_context>

<pallas_src>
import functools

import jax
import jax.numpy as jnp
from jax.experimental import pallas as pl
from jax.experimental.pallas import tpu as pltpu

LANE = 128


def _round_up(x, m):
    return ((x + m - 1) // m) * m


# ----------------------------- Pallas kernel ------------------------------ #

def ggc_kernel(h0_ref, adj_ref, w_ref, bagg_ref, wx_ref, wh_ref, bg_ref,
               out_ref, *, num_edge_types, kp, dp):
    """One grid step == one GGNN timestep.

    Hidden state lives in the resident output block (constant out_specs block
    index over the sequential T axis).  Per step:
      (1) one wide MXU push with a COMPACT contraction dim:
              h[:, :Kp] @ W_wide[t]  ->  [N, E*Dp]
      (2) E small MXU pushes (statically unrolled) accumulating the neighbor
          aggregation in f32; the accumulator is seeded with the precomputed
          degree-weighted message bias (no relayout, no wide bias add).
      (3) two accumulating compact-K GRU pushes (x side and h side); no
          [m_sum | h] lane concat.
    """
    t = pl.program_id(0)

    @pl.when(t == 0)
    def _():
        out_ref[...] = h0_ref[...]

    h = out_ref[...]                               # [N, Dp] f32, resident
    hk = h[:, :kp].astype(w_ref.dtype)             # compact-K operand

    # (1) messages for all edge types in one push: [N, E*Dp].
    m_wide = jnp.dot(hk, w_ref[...], preferred_element_type=jnp.float32)

    # (2) neighbor aggregation; f32 accumulator seeded with degree-weighted bias.
    m_sum = bagg_ref[...]                          # [N, Dp] f32
    for e in range(num_edge_types):                # static unroll; 128-aligned lane slices
        m_e = m_wide[:, e * dp:(e + 1) * dp].astype(adj_ref.dtype)
        m_sum = m_sum + jnp.dot(adj_ref[e], m_e,
                                preferred_element_type=jnp.float32)

    # (3) fused GRUCell as two compact-K pushes:
    #     g = [ gx_r+gh_r | gx_z+gh_z | gx_n | gh_n ]   (PyTorch gate order r,z,n)
    mk = m_sum[:, :kp].astype(wx_ref.dtype)
    g = (jnp.dot(mk, wx_ref[...], preferred_element_type=jnp.float32)
         + jnp.dot(hk, wh_ref[...], preferred_element_type=jnp.float32)
         + bg_ref[...])
    r = jax.nn.sigmoid(g[:, :dp])
    z = jax.nn.sigmoid(g[:, dp:2 * dp])
    n = jnp.tanh(g[:, 2 * dp:3 * dp] + r * g[:, 3 * dp:])
    out_ref[...] = (1.0 - z) * n + z * h


# ------------------------------- wrapper ---------------------------------- #

def gated_graph_conv(x, adj, weight, bias, weight_ih, weight_hh, bias_ih,
                     bias_hh, *, compute_dtype=jnp.bfloat16):
    """x: [N, C] (C <= D);  adj: [E, N, N] dense binary;  weight: [T, E, D, D];
    bias: [T, E, D];  weight_ih / weight_hh: [3*D, D] (PyTorch GRUCell layout,
    gate order r, z, n);  bias_ih / bias_hh: [3*D].  Returns h^(T): [N, D] f32.

    compute_dtype only affects matmul operands (adjacency, weights, casts of
    h / m_sum); accumulation and the GRU nonlinearity math stay in f32."""
    N, in_ch = x.shape
    T, E, D, _ = weight.shape
    if in_ch > D:
        raise ValueError("input channels must be <= input_dim")

    f32 = jnp.float32
    dp = _round_up(D, LANE)                                 # lane-dense output width
    sub = 8 if jnp.dtype(compute_dtype).itemsize == 4 else 16
    kp = _round_up(D, sub)                                  # compact contraction width

    # h0 = [x || 0], lane-padded.
    h0 = jnp.zeros((N, dp), f32).at[:, :in_ch].set(x.astype(f32))

    # Adjacency kept as [E, N, N]; binary, so the bf16 cast is exact.
    adj_c = adj.astype(compute_dtype)

    # W_wide[t][:, e*dp:(e+1)*dp] = W[t, e]  (K compacted to kp, lanes padded to dp).
    w_pad = jnp.zeros((T, E, kp, dp), f32).at[:, :, :D, :D].set(weight.astype(f32))
    w_wide = jnp.transpose(w_pad, (0, 2, 1, 3)).reshape(T, kp, E * dp)
    w_wide = w_wide.astype(compute_dtype)

    # Degree-weighted message bias: sum_j adj[e,i,j]*b[t,e,:] = deg[e,i]*b[t,e,:].
    deg = adj.astype(f32).sum(axis=2)                       # [E, N]
    bagg = jnp.einsum('en,ted->tnd', deg, bias.astype(f32))  # [T, N, D]
    bagg = jnp.zeros((T, N, dp), f32).at[:, :, :D].set(bagg)

    # GRU weights split into x / h sides, K compacted to kp, gate order r,z,n:
    #   W_x = [Wih_r^T | Wih_z^T | Wih_n^T | 0      ]
    #   W_h = [Whh_r^T | Whh_z^T | 0       | Whh_n^T]
    def gate_wt(w, g):
        blk = jnp.zeros((kp, dp), f32)
        return blk.at[:D, :D].set(w[g * D:(g + 1) * D, :].T.astype(f32))

    def gate_b(b, g):
        return jnp.zeros((dp,), f32).at[:D].set(b[g * D:(g + 1) * D].astype(f32))

    zero_blk = jnp.zeros((kp, dp), f32)
    w_x = jnp.concatenate([gate_wt(weight_ih, 0), gate_wt(weight_ih, 1),
                           gate_wt(weight_ih, 2), zero_blk], axis=1)
    w_h = jnp.concatenate([gate_wt(weight_hh, 0), gate_wt(weight_hh, 1),
                           zero_blk, gate_wt(weight_hh, 2)], axis=1)
    w_x = w_x.astype(compute_dtype)
    w_h = w_h.astype(compute_dtype)
    b_g = jnp.concatenate([
        gate_b(bias_ih, 0) + gate_b(bias_hh, 0),   # r: b_ih + b_hh pre-summed
        gate_b(bias_ih, 1) + gate_b(bias_hh, 1),   # z: b_ih + b_hh pre-summed
        gate_b(bias_ih, 2),                        # gx_n bias
        gate_b(bias_hh, 2),                        # gh_n bias
    ]).reshape(1, 4 * dp)

    kernel = functools.partial(ggc_kernel, num_edge_types=E, kp=kp, dp=dp)

    out = pl.pallas_call(
        kernel,
        out_shape=jax.ShapeDtypeStruct((N, dp), f32),
        grid_spec=pltpu.PrefetchScalarGridSpec(
            num_scalar_prefetch=0,
            grid=(T,),
            in_specs=[
                pl.BlockSpec((N, dp), lambda t: (0, 0)),               # h0
                pl.BlockSpec((E, N, N), lambda t: (0, 0, 0)),          # adjacency
                pl.BlockSpec((None, kp, E * dp), lambda t: (t, 0, 0)),  # W_wide[t]
                pl.BlockSpec((None, N, dp), lambda t: (t, 0, 0)),       # bias_agg[t]
                pl.BlockSpec((kp, 4 * dp), lambda t: (0, 0)),          # W_x
                pl.BlockSpec((kp, 4 * dp), lambda t: (0, 0)),          # W_h
                pl.BlockSpec((1, 4 * dp), lambda t: (0, 0)),           # b_g
            ],
            out_specs=pl.BlockSpec((N, dp), lambda t: (0, 0)),         # resident h
        ),
        compiler_params=pltpu.CompilerParams(
            dimension_semantics=("arbitrary",),        # GRU recurrence is sequential
            vmem_limit_bytes=32 * 1024 * 1024),        # safe on v5e/v6e/v7x at these shapes
    )(h0, adj_c, w_wide, bagg, w_x, w_h, b_g)

    return out[:, :D]


# ------------------------- pure-JAX reference ------------------------------ #

def reference(x, adj, weight, bias, weight_ih, weight_hh, bias_ih, bias_hh):
    HI = jax.lax.Precision.HIGHEST
    N, in_ch = x.shape
    T, E, D, _ = weight.shape
    h = x
    if in_ch < D:
        h = jnp.concatenate([h, jnp.zeros((N, D - in_ch), x.dtype)], axis=1)
    for t in range(T):
        m_sum = jnp.zeros((N, D), jnp.float32)
        for e in range(E):
            m = jnp.dot(h, weight[t, e], precision=HI) + bias[t, e]
            m_sum = m_sum + jnp.dot(adj[e], m, precision=HI)
        gx = jnp.dot(m_sum, weight_ih.T, precision=HI) + bias_ih
        gh = jnp.dot(h, weight_hh.T, precision=HI) + bias_hh
        r = jax.nn.sigmoid(gx[:, :D] + gh[:, :D])
        z = jax.nn.sigmoid(gx[:, D:2 * D] + gh[:, D:2 * D])
        n = jnp.tanh(gx[:, 2 * D:] + r * gh[:, 2 * D:])
        h = (1.0 - z) * n + z * h
    return h


# --------------------------------- main ------------------------------------ #

if __name__ == "__main__":
    # Small shapes consistent with the module's forward:
    #   N nodes, C input channels (< D), D = input_dim, E edge types, T steps.
    N, C, D, E, T = 64, 24, 32, 3, 2

    key = jax.random.PRNGKey(0)
    keys = jax.random.split(key, 10)

    # Node features and dense binary adjacency per edge type.
    x = jax.random.normal(keys[0], (N, C), dtype=jnp.float32)
    adj = (jax.random.uniform(keys[1], (E, N, N)) < 0.15).astype(jnp.float32)

    # Parameters, initialized per GatedGraphConv.__init__:
    #   weight[t, e] ~ xavier_uniform, bias ~ U(-0.01, 0.01),
    #   GRUCell params ~ U(-1/sqrt(D), 1/sqrt(D)).
    xavier_bound = (6.0 / (D + D)) ** 0.5
    weight = jax.random.uniform(keys[2], (T, E, D, D),
                                minval=-xavier_bound, maxval=xavier_bound)
    bias = jax.random.uniform(keys[3], (T, E, D), minval=-0.01, maxval=0.01)

    k = 1.0 / (D ** 0.5)
    weight_ih = jax.random.uniform(keys[4], (3 * D, D), minval=-k, maxval=k)
    weight_hh = jax.random.uniform(keys[5], (3 * D, D), minval=-k, maxval=k)
    bias_ih = jax.random.uniform(keys[6], (3 * D,), minval=-k, maxval=k)
    bias_hh = jax.random.uniform(keys[7], (3 * D,), minval=-k, maxval=k)

    ref = reference(x, adj, weight, bias, weight_ih, weight_hh,
                    bias_ih, bias_hh)

    # f32 operands: tight check against the HIGHEST-precision reference.
    out_f32 = gated_graph_conv(x, adj, weight, bias, weight_ih, weight_hh,
                               bias_ih, bias_hh, compute_dtype=jnp.float32)
    out_f32 = jax.block_until_ready(out_f32)
    assert out_f32.shape == (N, D) and out_f32.dtype == jnp.float32
    assert jnp.allclose(out_f32, ref, rtol=2e-3, atol=2e-3), (
        f"f32 max abs err {jnp.max(jnp.abs(out_f32 - ref))}")

    # bf16 operands (the perf default for v6e/v7x): loose check -- hidden state
    # and m_sum operands are re-rounded each timestep so error compounds over T.
    out_bf16 = gated_graph_conv(x, adj, weight, bias, weight_ih, weight_hh,
                                bias_ih, bias_hh)   # compute_dtype=bfloat16
    out_bf16 = jax.block_until_ready(out_bf16)
    assert out_bf16.shape == (N, D) and out_bf16.dtype == jnp.float32
    assert jnp.allclose(out_bf16, ref, rtol=1e-1, atol=1e-1), (
        f"bf16 max abs err {jnp.max(jnp.abs(out_bf16 - ref))}")

    print("KERNEL_OK")
</pallas_src>

<mosaic_0001>
module attributes {stable_mosaic.version = 11 : i64} {
  func.func @ggc_kernel(%arg0: i32, %arg1: memref<64x128xf32, #tpu.memory_space<vmem>>, %arg2: memref<3x64x64xf32, #tpu.memory_space<vmem>>, %arg3: memref<1x32x384xf32, #tpu.memory_space<vmem>>, %arg4: memref<1x64x128xf32, #tpu.memory_space<vmem>>, %arg5: memref<32x512xf32, #tpu.memory_space<vmem>>, %arg6: memref<32x512xf32, #tpu.memory_space<vmem>>, %arg7: memref<1x512xf32, #tpu.memory_space<vmem>>, %arg8: memref<64x128xf32, #tpu.memory_space<vmem>>) attributes {dimension_semantics = [#tpu.dimension_semantics<arbitrary>], iteration_bounds = array<i64: 2>, scalar_prefetch = 0 : i64, scratch_operands = 0 : i64, tpu.core_type = #tpu.core_type<tc>, window_params = [{pipeline_mode = #tpu.pipeline_mode<synchronous>, transform_indices = @transform_0, window_bounds = array<i64: 64, 128>}, {pipeline_mode = #tpu.pipeline_mode<synchronous>, transform_indices = @transform_1, window_bounds = array<i64: 3, 64, 64>}, {transform_indices = @transform_2, window_bounds = array<i64: 1, 32, 384>}, {transform_indices = @transform_3, window_bounds = array<i64: 1, 64, 128>}, {pipeline_mode = #tpu.pipeline_mode<synchronous>, transform_indices = @transform_4, window_bounds = array<i64: 32, 512>}, {pipeline_mode = #tpu.pipeline_mode<synchronous>, transform_indices = @transform_5, window_bounds = array<i64: 32, 512>}, {pipeline_mode = #tpu.pipeline_mode<synchronous>, transform_indices = @transform_6, window_bounds = array<i64: 1, 512>}, {pipeline_mode = #tpu.pipeline_mode<synchronous>, transform_indices = @transform_7, window_bounds = array<i64: 64, 128>}]} {
    %c0_i32 = arith.constant 0 : i32
    %0 = arith.cmpi eq, %arg0, %c0_i32 : i32
    %1 = arith.extui %0 : i1 to i32
    %c0_i32_0 = arith.constant 0 : i32
    %2 = arith.cmpi ne, %1, %c0_i32_0 : i32
    scf.if %2 {
      %c0_31 = arith.constant 0 : index
      %c0_32 = arith.constant 0 : index
      %57 = vector.load %arg1[%c0_31, %c0_32] : memref<64x128xf32, #tpu.memory_space<vmem>>, vector<64x128xf32>
      %c0_33 = arith.constant 0 : index
      %c0_34 = arith.constant 0 : index
      %58 = vector.load %arg8[%c0_33, %c0_34] : memref<64x128xf32, #tpu.memory_space<vmem>>, vector<64x128xf32>
      tpu.vector_store %arg8[%c0_33, %c0_34], %57 {strides = array<i32>} : memref<64x128xf32, #tpu.memory_space<vmem>>, vector<64x128xf32>,
    } else {
    }
    %c0 = arith.constant 0 : index
    %c0_1 = arith.constant 0 : index
    %3 = vector.load %arg8[%c0, %c0_1] : memref<64x128xf32, #tpu.memory_space<vmem>>, vector<64x128xf32>
    %4 = vector.extract_strided_slice %3 {offsets = [0, 0], sizes = [64, 32], strides = [1, 1]} : vector<64x128xf32> to vector<64x32xf32>
    %c0_2 = arith.constant 0 : index
    %c0_3 = arith.constant 0 : index
    %c0_4 = arith.constant 0 : index
    %5 = vector.load %arg3[%c0_2, %c0_3, %c0_4] : memref<1x32x384xf32, #tpu.memory_space<vmem>>, vector<1x32x384xf32>
    %6 = vector.shape_cast %5 : vector<1x32x384xf32> to vector<32x384xf32>
    %cst = arith.constant dense<0.000000e+00> : vector<64x384xf32>
    %7 = tpu.matmul %4, %6, %cst {dimension_numbers = #tpu.dot_dimension_numbers<[1], [0], [0], [1], [0, 0, 1, 1], [], []>} : vector<64x32xf32>, vector<32x384xf32>, vector<64x384xf32> -> vector<64x384xf32>
    %c0_5 = arith.constant 0 : index
    %c0_6 = arith.constant 0 : index
    %c0_7 = arith.constant 0 : index
    %8 = vector.load %arg4[%c0_5, %c0_6, %c0_7] : memref<1x64x128xf32, #tpu.memory_space<vmem>>, vector<1x64x128xf32>
    %9 = vector.shape_cast %8 : vector<1x64x128xf32> to vector<64x128xf32>
    %10 = vector.extract_strided_slice %7 {offsets = [0, 0], sizes = [64, 128], strides = [1, 1]} : vector<64x384xf32> to vector<64x128xf32>
    %c0_8 = arith.constant 0 : index
    %c0_9 = arith.constant 0 : index
    %c0_10 = arith.constant 0 : index
    %11 = vector.load %arg2[%c0_8, %c0_9, %c0_10] : memref<3x64x64xf32, #tpu.memory_space<vmem>>, vector<1x64x64xf32>
    %12 = vector.shape_cast %11 : vector<1x64x64xf32> to vector<64x64xf32>
    %cst_11 = arith.constant dense<0.000000e+00> : vector<64x128xf32>
    %13 = tpu.matmul %12, %10, %cst_11 {dimension_numbers = #tpu.dot_dimension_numbers<[1], [0], [0], [1], [0, 0, 1, 1], [], []>} : vector<64x64xf32>, vector<64x128xf32>, vector<64x128xf32> -> vector<64x128xf32>
    %14 = arith.addf %9, %13 : vector<64x128xf32>
    %15 = vector.extract_strided_slice %7 {offsets = [0, 128], sizes = [64, 128], strides = [1, 1]} : vector<64x384xf32> to vector<64x128xf32>
    %c1 = arith.constant 1 : index
    %c0_12 = arith.constant 0 : index
    %c0_13 = arith.constant 0 : index
    %16 = vector.load %arg2[%c1, %c0_12, %c0_13] : memref<3x64x64xf32, #tpu.memory_space<vmem>>, vector<1x64x64xf32>
    %17 = vector.shape_cast %16 : vector<1x64x64xf32> to vector<64x64xf32>
    %cst_14 = arith.constant dense<0.000000e+00> : vector<64x128xf32>
    %18 = tpu.matmul %17, %15, %cst_14 {dimension_numbers = #tpu.dot_dimension_numbers<[1], [0], [0], [1], [0, 0, 1, 1], [], []>} : vector<64x64xf32>, vector<64x128xf32>, vector<64x128xf32> -> vector<64x128xf32>
    %19 = arith.addf %14, %18 : vector<64x128xf32>
    %20 = vector.extract_strided_slice %7 {offsets = [0, 256], sizes = [64, 128], strides = [1, 1]} : vector<64x384xf32> to vector<64x128xf32>
    %c2 = arith.constant 2 : index
    %c0_15 = arith.constant 0 : index
    %c0_16 = arith.constant 0 : index
    %21 = vector.load %arg2[%c2, %c0_15, %c0_16] : memref<3x64x64xf32, #tpu.memory_space<vmem>>, vector<1x64x64xf32>
    %22 = vector.shape_cast %21 : vector<1x64x64xf32> to vector<64x64xf32>
    %cst_17 = arith.constant dense<0.000000e+00> : vector<64x128xf32>
    %23 = tpu.matmul %22, %20, %cst_17 {dimension_numbers = #tpu.dot_dimension_numbers<[1], [0], [0], [1], [0, 0, 1, 1], [], []>} : vector<64x64xf32>, vector<64x128xf32>, vector<64x128xf32> -> vector<64x128xf32>
    %24 = arith.addf %19, %23 : vector<64x128xf32>
    %25 = vector.extract_strided_slice %24 {offsets = [0, 0], sizes = [64, 32], strides = [1, 1]} : vector<64x128xf32> to vector<64x32xf32>
    %c0_18 = arith.constant 0 : index
    %c0_19 = arith.constant 0 : index
    %26 = vector.load %arg5[%c0_18, %c0_19] : memref<32x512xf32, #tpu.memory_space<vmem>>, vector<32x512xf32>
    %cst_20 = arith.constant dense<0.000000e+00> : vector<64x512xf32>
    %27 = tpu.matmul %25, %26, %cst_20 {dimension_numbers = #tpu.dot_dimension_numbers<[1], [0], [0], [1], [0, 0, 1, 1], [], []>} : vector<64x32xf32>, vector<32x512xf32>, vector<64x512xf32> -> vector<64x512xf32>
    %c0_21 = arith.constant 0 : index
    %c0_22 = arith.constant 0 : index
    %28 = vector.load %arg6[%c0_21, %c0_22] : memref<32x512xf32, #tpu.memory_space<vmem>>, vector<32x512xf32>
    %cst_23 = arith.constant dense<0.000000e+00> : vector<64x512xf32>
    %29 = tpu.matmul %4, %28, %cst_23 {dimension_numbers = #tpu.dot_dimension_numbers<[1], [0], [0], [1], [0, 0, 1, 1], [], []>} : vector<64x32xf32>, vector<32x512xf32>, vector<64x512xf32> -> vector<64x512xf32>
    %30 = arith.addf %27, %29 : vector<64x512xf32>
    %c0_24 = arith.constant 0 : index
    %c0_25 = arith.constant 0 : index
    %31 = vector.load %arg7[%c0_24, %c0_25] : memref<1x512xf32, #tpu.memory_space<vmem>>, vector<1x512xf32>
    %32 = vector.broadcast %31 : vector<1x512xf32> to vector<64x512xf32>
    %33 = arith.addf %30, %32 : vector<64x512xf32>
    %34 = vector.extract_strided_slice %33 {offsets = [0, 0], sizes = [64, 128], strides = [1, 1]} : vector<64x512xf32> to vector<64x128xf32>
    %35 = arith.negf %34 : vector<64x128xf32>
    %36 = math.exp %35 : vector<64x128xf32>
    %cst_26 = arith.constant 1.000000e+00 : f32
    %37 = vector.broadcast %cst_26 : f32 to vector<64x128xf32>
    %38 = arith.addf %37, %36 : vector<64x128xf32>
    %39 = arith.divf %37, %38 : vector<64x128xf32>
    %40 = vector.extract_strided_slice %33 {offsets = [0, 128], sizes = [64, 128], strides = [1, 1]} : vector<64x512xf32> to vector<64x128xf32>
    %41 = arith.negf %40 : vector<64x128xf32>
    %42 = math.exp %41 : vector<64x128xf32>
    %cst_27 = arith.constant 1.000000e+00 : f32
    %43 = vector.broadcast %cst_27 : f32 to vector<64x128xf32>
    %44 = arith.addf %43, %42 : vector<64x128xf32>
    %45 = arith.divf %43, %44 : vector<64x128xf32>
    %46 = vector.extract_strided_slice %33 {offsets = [0, 256], sizes = [64, 128], strides = [1, 1]} : vector<64x512xf32> to vector<64x128xf32>
    %47 = vector.extract_strided_slice %33 {offsets = [0, 384], sizes = [64, 128], strides = [1, 1]} : vector<64x512xf32> to vector<64x128xf32>
    %48 = arith.mulf %39, %47 : vector<64x128xf32>
    %49 = arith.addf %46, %48 : vector<64x128xf32>
    %50 = math.tanh %49 : vector<64x128xf32>
    %cst_28 = arith.constant 1.000000e+00 : f32
    %51 = vector.broadcast %cst_28 : f32 to vector<64x128xf32>
    %52 = arith.subf %51, %45 : vector<64x128xf32>
    %53 = arith.mulf %52, %50 : vector<64x128xf32>
    %54 = arith.mulf %45, %3 : vector<64x128xf32>
    %55 = arith.addf %53, %54 : vector<64x128xf32>
    %c0_29 = arith.constant 0 : index
    %c0_30 = arith.constant 0 : index
    %56 = vector.load %arg8[%c0_29, %c0_30] : memref<64x128xf32, #tpu.memory_space<vmem>>, vector<64x128xf32>
    tpu.vector_store %arg8[%c0_29, %c0_30], %55 {strides = array<i32>} : memref<64x128xf32, #tpu.memory_space<vmem>>, vector<64x128xf32>,
    return
  }
  func.func @transform_0(%arg0: i32) -> (i32, i32) {
    %c0_i32 = arith.constant 0 : i32
    %c0_i32_0 = arith.constant 0 : i32
    %c0_i32_1 = arith.constant 0 : i32
    return %c0_i32, %c0_i32_0 : i32, i32
  }
  func.func @transform_1(%arg0: i32) -> (i32, i32, i32) {
    %c0_i32 = arith.constant 0 : i32
    %c0_i32_0 = arith.constant 0 : i32
    %c0_i32_1 = arith.constant 0 : i32
    %c0_i32_2 = arith.constant 0 : i32
    return %c0_i32, %c0_i32_0, %c0_i32_1 : i32, i32, i32
  }
  func.func @transform_2(%arg0: i32) -> (i32, i32, i32) {
    %c0_i32 = arith.constant 0 : i32
    %c0_i32_0 = arith.constant 0 : i32
    %c0_i32_1 = arith.constant 0 : i32
    return %arg0, %c0_i32, %c0_i32_0 : i32, i32, i32
  }
  func.func @transform_3(%arg0: i32) -> (i32, i32, i32) {
    %c0_i32 = arith.constant 0 : i32
    %c0_i32_0 = arith.constant 0 : i32
    %c0_i32_1 = arith.constant 0 : i32
    return %arg0, %c0_i32, %c0_i32_0 : i32, i32, i32
  }
  func.func @transform_4(%arg0: i32) -> (i32, i32) {
    %c0_i32 = arith.constant 0 : i32
    %c0_i32_0 = arith.constant 0 : i32
    %c0_i32_1 = arith.constant 0 : i32
    return %c0_i32, %c0_i32_0 : i32, i32
  }
  func.func @transform_5(%arg0: i32) -> (i32, i32) {
    %c0_i32 = arith.constant 0 : i32
    %c0_i32_0 = arith.constant 0 : i32
    %c0_i32_1 = arith.constant 0 : i32
    return %c0_i32, %c0_i32_0 : i32, i32
  }
  func.func @transform_6(%arg0: i32) -> (i32, i32) {
    %c0_i32 = arith.constant 0 : i32
    %c0_i32_0 = arith.constant 0 : i32
    %c0_i32_1 = arith.constant 0 : i32
    return %c0_i32, %c0_i32_0 : i32, i32
  }
  func.func @transform_7(%arg0: i32) -> (i32, i32) {
    %c0_i32 = arith.constant 0 : i32
    %c0_i32_0 = arith.constant 0 : i32
    %c0_i32_1 = arith.constant 0 : i32
    return %c0_i32, %c0_i32_0 : i32, i32
  }
}

</mosaic_0001>

<bundles_post_ra>
// kernel: tpu_custom_call.1
= control target key start
LH: loop header
LB: loop body
LE: loop exit
PB: predicated region body
PF: predicated region fallthrough
CT: control target
= control target key end

     0   :  { %s3434_s0 = inlined_call_operand.hbm [shape: f32[64,128], index: 0, kind: input, shape index: {}]   ;;  %s3435_s1 = inlined_call_operand.hbm [shape: f32[3,64,64], index: 1, kind: input, shape index: {}]   ;;  %s3436_s2 = inlined_call_operand.hbm [shape: f32[2,32,384], index: 2, kind: input, shape index: {}]   ;;  %s3437_s3 = inlined_call_operand.hbm [shape: f32[2,64,128], index: 3, kind: input, shape index: {}]   ;;  %s3438_s4 = inlined_call_operand.hbm [shape: f32[32,512], index: 4, kind: input, shape index: {}]   ;;  %s3439_s5 = inlined_call_operand.hbm [shape: f32[32,512], index: 5, kind: input, shape index: {}]   ;;  %s3440_s6 = inlined_call_operand.vmem [shape: f32[1,512], index: 6, kind: input, shape index: {}]   ;;  %s3441_s7 = inlined_call_operand.hbm [shape: f32[64,128], index: 7, kind: output, shape index: {}]  }
   0x1   :  { %3455 = sst [smem:[#allocation21_spill]] %s3434_s0 }
   0x2   :  { %3456 = sst [smem:[#allocation22_spill]] %s3435_s1 }
   0x3   :  { %3457 = sst [smem:[#allocation23_spill]] %s3436_s2 }
   0x4   :  { %12 = vsyncpa [#allocation3], 0 }
   0x5   :  { %13 = vsyncpa [#allocation6], 0 }
   0x6   :  { %14 = vsyncpa [#allocation11], 0 }
   0x7   :  { %15 = vsyncpa [#allocation4], 0  ;;  %s2875_s24 = smov 0   ;;  %s2877_s25 = smov 0  }
   0x8   :  { %s2879_s26 = smov 0   ;;  %s2881_s27 = smov 0  }
   0x9 LB: > { %s2894_s28 = sadd.s32 4294967295, %s2817_s27   ;;  %p83_p0 = scmp.ne.s32.totalorder %s2809_s25, %s2805_s24  ;;  %s2817_s27 = sphi %s2881_s27, %s3486_s27   ;;  %s2813_s26 = sphi %s2879_s26, %s3490_s26   ;;  %s2809_s25 = sphi %s2877_s25, %s3489_s25   ;;  %s2805_s24 = sphi %s2875_s24, %s3488_s24  }
   0xa   : > { %p3442_p1 = scmp.eq.s32.totalorder %s2894_s28, 0  ;;  %p1947_p2 = scmp.ge.s32.totalorder %s2817_s27, 1 }
   0xb   : > { %p204_p3 = scmp.lt.s32.totalorder %s2817_s27, 3  ;;  %s2819_s8 = smov [#allocation2]  }
   0xc   : > { %p2903_p5 = por %p3442_p1, %p83_p0  ;;  %s216_s9 = sshll.u32 %s2819_s8, 4  ;;  %s217_s9 = int_to_ptr.vmem [resolvable:$true] %s216_s9 }
   0xd   : > { %p2907_p6 = pnand %p1947_p2, %p204_p3  ;;  %s2820_s11 = smov [#allocation5]  }
   0xe   : > { %s3458_s29 = scalar_select %p2903_p5, 1, 0 }
   0xf   : > { %s3459_s30 = scalar_select %p2907_p6, 1, 0 }
  0x10   : > { %p2404_p7 = pneg %p2907_p6  ;;  %s229_s12 = sshll.u32 %s2820_s11, 4  ;;  %s2919_s12 = int_to_ptr.vmem [resolvable:$true] %s229_s12 }
  0x11   : > { %s3461_s0 = sld [smem:[#allocation21_spill]] }
  0x12   : > { %p2915_p8 = pnand %p2404_p7, %p3442_p1 }
  0x14   : > { %s3460_s10 = scalar_select %p2915_p8, 1, 0 }
  0x15   : > { %p2929_p10 = pneg %p2915_p8 }
  0x17   : > { %s2565_s15 = scalar_lea.hbm %s3461_s0, 1024 }
  0x18   : > { %p2566_p9 = scmp.ne.s32.totalorder %s3461_s0, %s2565_s15  ;;  %p2572_p13 = scmp.lt.u32.totalorder %s2565_s15, %s3461_s0 }
  0x1a   : > { %p2568_p11 = pnand %p2929_p10, %p2566_p9 }
  0x1c   : > { %p2569_p12 = pneg %p2568_p11 }
  0x1e   : > { %p2574_p0 = pnand %p2572_p13, %p2569_p12 }
  0x20   : > { %2577 = shalt.err (!%p2574_p0)
}
  0x21   : > { %s2578_s21 = scalar_lea.vmem %s217_s9, 1024  ;;  %p2586_p4 = scmp.lt.s32.totalorder %s217_s9, %s217_s9 }
  0x22   : > { %p2579_p2 = scmp.ne.s32.totalorder %s217_s9, %s2578_s21  ;;  %p2587_p1 = scmp.lt.s32.totalorder %s2578_s21, %s2578_s21 }
  0x24   : > { %p2581_p3 = pnand %p2579_p2, %p2929_p10  ;;  %p2588_p5 = por %p2587_p1, %p2586_p4 }
  0x26   : > { %p2582_p7 = pneg %p2581_p3 }
  0x28   : > { %p2589_p6 = pnand %p2588_p5, %p2582_p7 }
  0x2a   : > { %2592 = shalt.err (!%p2589_p6)
}
  0x2b   : > { %s3445_s22 = smov 128   ;;  %s3446_s23 = smov 8  }
  0x2c   : > { %2407 = dma.hbm_to_vmem [thread:$0]  (!%p2915_p8), %s3461_s0, 1024, %s217_s9, [#allocation3], %s3445_s22, %s3445_s22, %s3446_s23  }
  0x2d   : > { %s3463_s1 = sld [smem:[#allocation22_spill]] }
  0x33   : > { %s2593_s14 = scalar_lea.hbm %s3463_s1, 3072 }
  0x34   : > { %p2594_p1 = scmp.ne.s32.totalorder %s3463_s1, %s2593_s14  ;;  %p2600_p6 = scmp.lt.u32.totalorder %s2593_s14, %s3463_s1 }
  0x36   : > { %p2596_p4 = pnand %p2594_p1, %p2929_p10 }
  0x38   : > { %p2597_p5 = pneg %p2596_p4 }
  0x3a   : > { %p2602_p9 = pnand %p2600_p6, %p2597_p5 }
  0x3c   : > { %2605 = shalt.err (!%p2602_p9)
}
  0x3d   : > { %s2606_s9 = scalar_lea.vmem %s2919_s12, 3072  ;;  %p2614_p0 = scmp.lt.s32.totalorder %s2919_s12, %s2919_s12 }
  0x3e   : > { %p2607_p11 = scmp.ne.s32.totalorder %s2919_s12, %s2606_s9  ;;  %p2615_p2 = scmp.lt.s32.totalorder %s2606_s9, %s2606_s9 }
  0x40   : > { %p2609_p12 = pnand %p2607_p11, %p2929_p10  ;;  %p2616_p3 = por %p2615_p2, %p2614_p0 }
  0x42   : > { %p2610_p13 = pneg %p2609_p12 }
  0x44   : > { %p2617_p7 = pnand %p2616_p3, %p2610_p13 }
  0x46   : > { %2620 = shalt.err (!%p2617_p7)
}
  0x47   : > { %2410 = dma.hbm_to_vmem [thread:$0]  (!%p2915_p8), %s3463_s1, 3072, %s2919_s12, [#allocation6], %s3445_s22, %s3445_s22, %s3446_s23  }
  0x48   : > { %s2975_s24 = sadd.s32 1, %s2817_s27   ;;  %s70_s8 = sadd.s32 1, %s2813_s26 }
  0x49   : > { %3464 = sst [smem:[#allocation19_spill]] %s2975_s24  ;;  %s67_s11 = ssub.s32 %s2817_s27, %s2975_s24 }
  0x4a   : > { %p77_p1 = scmp.ne.s32.totalorder %s2813_s26, %s2809_s25  ;;  %p68_p4 = scmp.eq.s32.totalorder %s67_s11, 0 }
  0x4b   : > { %p78_p5 = scmp.eq.s32.totalorder %s2817_s27, 0  ;;  %p2428_p6 = scmp.lt.s32.totalorder %s2817_s27, 2 }
  0x4c   : > { %s272_s13 = sand.u32 1, %s2817_s27   ;;  %s3447_s15 = sand.u32 1, %s2813_s26  }
  0x4d   : > { %s2986_s14 = scalar_select %p68_p4, %s2813_s26, %s70_s8  }
  0x4e   : > { %p79_p9 = por %p78_p5, %p77_p1  ;;  %s2378_s16 = smul.u32 1536, %s2817_s27 }
  0x4f   : > { %3465 = sst [smem:[#allocation20_spill]] %s2986_s14  ;;  %s2377_s17 = smul.u32 96, %s3447_s15 }
  0x50   : > { %p2992_p11 = pnand %p2428_p6, %p79_p9  ;;  %s3467_s2 = sld [smem:[#allocation23_spill]] }
  0x51   : > { %s276_s21 = scalar_lea.vmem [#allocation7], %s2377_s17  ;;  %s3003_s11 = scalar_lea.sflag [#allocation3], %s272_s13 }
  0x52   : > { %s3466_s19 = scalar_select %p2992_p11, 1, 0 }
  0x53   : > { %s283_s8 = sshll.u32 %s276_s21, 4  ;;  %p3450_p13 = pneg %p2992_p11  ;;  %s3001_s8 = int_to_ptr.vmem [resolvable:$true] %s283_s8 }
  0x56   : > { %s2999_s20 = scalar_lea.hbm %s3467_s2, %s2378_s16  ;;  %s2626_s9 = scalar_lea.hbm %s3467_s2, 3072 }
  0x57   : > { %s2621_s22 = scalar_lea.hbm %s2999_s20, 1536  ;;  %p2627_p3 = scmp.lt.u32.totalorder %s2999_s20, %s3467_s2 }
  0x58   : > { %p2622_p12 = scmp.ne.s32.totalorder %s2999_s20, %s2621_s22  ;;  %p2628_p7 = scmp.lt.u32.totalorder %s2626_s9, %s2621_s22 }
  0x59   : > { %p2630_p4 = scmp.lt.u32.totalorder %s2621_s22, %s2999_s20 }
  0x5a   : > { %p2624_p0 = pnand %p3450_p13, %p2622_p12  ;;  %p2629_p1 = por %p2628_p7, %p2627_p3 }
  0x5c   : > { %p2625_p2 = pneg %p2624_p0  ;;  %p2631_p5 = por %p2630_p4, %p2629_p1 }
  0x5e   : > { %p2632_p6 = pnand %p2631_p5, %p2625_p2 }
  0x60   : > { %2635 = shalt.err (!%p2632_p6)
}
  0x61   : > { %s2636_s13 = scalar_lea.vmem %s3001_s8, 1536  ;;  %s2823_s17 = smov [#allocation7]  }
  0x62   : > { %p2637_p9 = scmp.ne.s32.totalorder %s3001_s8, %s2636_s13  ;;  %s2641_s21 = sshll.u32 %s2823_s17, 4  ;;  %s2642_s21 = int_to_ptr.vmem [resolvable:$false] %s2641_s21 }
  0x63   : > { %s2643_s23 = scalar_lea.vmem %s2642_s21, 3072  ;;  %p2644_p8 = scmp.lt.s32.totalorder %s3001_s8, %s2642_s21 }
  0x64   : > { %p2639_p12 = pnand %p2637_p9, %p3450_p13  ;;  %p2645_p3 = scmp.lt.s32.totalorder %s2643_s23, %s2636_s13 }
  0x66   : > { %p2640_p0 = pneg %p2639_p12  ;;  %p2646_p7 = por %p2645_p3, %p2644_p8 }
  0x68   : > { %p2647_p1 = pnand %p2646_p7, %p2640_p0 }
  0x6a   : > { %2650 = shalt.err (!%p2647_p1)
}
  0x6b   : > { %s2824_s22 = smov 384   ;;  %s2825_s15 = smov 24  }
  0x6c   : > { %2420 = dma.hbm_to_vmem [thread:$0]  (!%p2992_p11), %s2999_s20, 1536, %s3001_s8, %s3003_s11, %s2824_s22, %s2824_s22, %s2825_s15  }
  0x6d   : > { %s2826_s16 = smov [#allocation9]   ;;  %s2651_s21 = scalar_lea.hbm %s3438_s4, 2048 }
  0x6e   : > { %s242_s12 = sshll.u32 %s2826_s16, 4  ;;  %p2652_p8 = scmp.ne.s32.totalorder %s3438_s4, %s2651_s21  ;;  %s243_s12 = int_to_ptr.vmem [resolvable:$true] %s242_s12 }
  0x6f   : > { %p2658_p5 = scmp.lt.u32.totalorder %s2651_s21, %s3438_s4 }
  0x70   : > { %p2654_p2 = pnand %p2652_p8, %p2929_p10 }
  0x72   : > { %p2655_p4 = pneg %p2654_p2 }
  0x74   : > { %p2660_p6 = pnand %p2658_p5, %p2655_p4 }
  0x76   : > { %2663 = shalt.err (!%p2660_p6)
}
  0x77   : > { %s2664_s20 = scalar_lea.vmem %s243_s12, 2048  ;;  %p2672_p3 = scmp.lt.s32.totalorder %s243_s12, %s243_s12 }
  0x78   : > { %p2665_p9 = scmp.ne.s32.totalorder %s243_s12, %s2664_s20  ;;  %p2673_p7 = scmp.lt.s32.totalorder %s2664_s20, %s2664_s20 }
  0x7a   : > { %p2667_p12 = pnand %p2665_p9, %p2929_p10  ;;  %p2674_p1 = por %p2673_p7, %p2672_p3 }
  0x7c   : > { %p2668_p0 = pneg %p2667_p12 }
  0x7e   : > { %p2675_p13 = pnand %p2674_p1, %p2668_p0 }
  0x80   : > { %2678 = shalt.err (!%p2675_p13)
}
  0x81   : > { %s2827_s8 = smov 512   ;;  %s2828_s0 = smov 32  }
  0x82   : > { %p3468_p8 = scmp.ne.s32.totalorder %s3460_s10, 0  ;;  %s3469_s15 = sand.u32 1, %s2813_s26  }
  0x83   : > { %s1954_s16 = sshll.u32 %s3469_s15, 6  ;;  %s2829_s9 = smov [#allocation10]  }
  0x84   : > { %2413 = dma.hbm_to_vmem [thread:$0]  (!%p3468_p8), %s3438_s4, 2048, %s243_s12, [#allocation6], %s2827_s8, %s2827_s8, %s2828_s0  }
  0x85   : > { %s255_s17 = sshll.u32 %s2829_s9, 4  ;;  %s2056_s21 = sshll.u32 %s2817_s27, 10  ;;  %s256_s17 = int_to_ptr.vmem [resolvable:$true] %s255_s17 }
  0x86   : > { %s2679_s20 = scalar_lea.hbm %s3439_s5, 2048 }
  0x87   : > { %p2680_p13 = scmp.ne.s32.totalorder %s3439_s5, %s2679_s20  ;;  %p2686_p5 = scmp.lt.u32.totalorder %s2679_s20, %s3439_s5 }
  0x89   : > { %p2682_p2 = pnand %p2680_p13, %p2929_p10 }
  0x8b   : > { %p2683_p4 = pneg %p2682_p2 }
  0x8d   : > { %p2688_p6 = pnand %p2686_p5, %p2683_p4 }
  0x8f   : > { %2691 = shalt.err (!%p2688_p6)
}
  0x90   : > { %s2692_s12 = scalar_lea.vmem %s256_s17, 2048  ;;  %p2700_p3 = scmp.lt.s32.totalorder %s256_s17, %s256_s17 }
  0x91   : > { %p2693_p9 = scmp.ne.s32.totalorder %s256_s17, %s2692_s12  ;;  %p2701_p7 = scmp.lt.s32.totalorder %s2692_s12, %s2692_s12 }
  0x93   : > { %p2695_p12 = pnand %p2693_p9, %p2929_p10  ;;  %p2702_p1 = por %p2701_p7, %p2700_p3 }
  0x95   : > { %p2696_p0 = pneg %p2695_p12 }
  0x97   : > { %p2703_p11 = pnand %p2702_p1, %p2696_p0 }
  0x99   : > { %2706 = shalt.err (!%p2703_p11)
}
  0x9a   : > { %2416 = dma.hbm_to_vmem [thread:$0]  (!%p3468_p8), %s3439_s5, 2048, %s256_s17, [#allocation11], %s2827_s8, %s2827_s8, %s2828_s0  }
  0x9b   : > { %s3073_s22 = scalar_lea.hbm %s3437_s3, %s2056_s21  ;;  %s297_s18 = scalar_lea.vmem [#allocation8], %s1954_s16 }
  0x9c   : > { %s304_s15 = sshll.u32 %s297_s18, 4  ;;  %s2707_s9 = scalar_lea.hbm %s3073_s22, 1024  ;;  %s3075_s15 = int_to_ptr.vmem [resolvable:$true] %s304_s15 }
  0x9d   : > { %p2708_p10 = scmp.ne.s32.totalorder %s3073_s22, %s2707_s9  ;;  %p3470_p11 = scmp.ne.s32.totalorder %s3466_s19, 0 }
  0x9e   : > { %s2712_s0 = scalar_lea.hbm %s3437_s3, 2048  ;;  %p2713_p8 = scmp.lt.u32.totalorder %s3073_s22, %s3437_s3 }
  0x9f   : > { %p3471_p13 = pneg %p3470_p11  ;;  %p2714_p5 = scmp.lt.u32.totalorder %s2712_s0, %s2707_s9 }
  0xa0   : > { %p2716_p9 = scmp.lt.u32.totalorder %s2707_s9, %s3073_s22 }
  0xa1   : > { %p2710_p2 = pnand %p2708_p10, %p3471_p13  ;;  %p2715_p6 = por %p2714_p5, %p2713_p8 }
  0xa3   : > { %p2711_p4 = pneg %p2710_p2  ;;  %p2717_p12 = por %p2716_p9, %p2715_p6 }
  0xa5   : > { %p2718_p0 = pnand %p2717_p12, %p2711_p4 }
  0xa7   : > { %2721 = shalt.err (!%p2718_p0)
}
  0xa8   : > { %s2722_s16 = scalar_lea.vmem %s3075_s15, 1024  ;;  %p3472_p7 = pmov %p3471_p13 }
  0xa9   : > { %p2723_p3 = scmp.ne.s32.totalorder %s3075_s15, %s2722_s16  ;;  %s2830_s13 = smov [#allocation8]  }
  0xaa   : > { %s2727_s23 = sshll.u32 %s2830_s13, 4  ;;  %s2728_s23 = int_to_ptr.vmem [resolvable:$false] %s2727_s23 }
  0xab   : > { %p2725_p1 = pnand %p2723_p3, %p3472_p7  ;;  %s2729_s20 = scalar_lea.vmem %s2728_s23, 2048 }
  0xac   : > { %p2730_p13 = scmp.lt.s32.totalorder %s3075_s15, %s2728_s23  ;;  %p2731_p2 = scmp.lt.s32.totalorder %s2729_s20, %s2722_s16 }
  0xad   : > { %p2726_p10 = pneg %p2725_p1 }
  0xae   : > { %p2732_p8 = por %p2731_p2, %p2730_p13 }
  0xb0   : > { %p2733_p5 = pnand %p2732_p8, %p2726_p10 }
  0xb2   : > { %2736 = shalt.err (!%p2733_p5)
}
  0xb3   : > { %s3473_s1 = smov 8   ;;  %s3474_s12 = smov 128  }
  0xb4   : > { %2423 = dma.hbm_to_vmem [thread:$0]  (!%p3470_p11), %s3073_s22, 1024, %s3075_s15, %s3003_s11, %s3474_s12, %s3474_s12, %s3473_s1  }
  0xb5   : > { %p3475_p4 = scmp.ne.s32.totalorder %s3459_s30, 0 }
  0xb6   : > { %p3476_p6 = scmp.eq.s32.totalorder (!%p3475_p4), %s2894_s28, 0 }
  0xb7   : > { %316 = sbr.rel (%p3475_p4) target bundleno = 1028 (0x404), region = 48 }
  0xbe   : > { %2780 = dma.done.wait (%p3476_p6), [#allocation3], 1024   ;;  %p3477_p9 = pmov %p3476_p6 }
  0xbf   : > { %p3478_p12 = pmov %p3476_p6 }
  0xc0   : > { %2782 = vsyncadd (%p3477_p9), [#allocation3], 4294966272 }
  0xc1   : > { %2784 = dma.done.wait (%p3478_p12), [#allocation6], 3072   ;;  %p3479_p0 = pmov %p3476_p6 }
  0xc2   : > { %s326_s19 = sand.u32 1, %s2894_s28   ;;  %s328_s11 = sand.u32 1, %s2809_s25  }
  0xc3   : > { %2786 = vsyncadd (%p3479_p0), [#allocation6], 4294964224  ;;  %s2379_s2 = smul.u32 96, %s328_s11  ;;  %s327_s30 = scalar_lea.sflag [#allocation3], %s326_s19 }
  0xc4   : > { %p3480_p11 = scmp.ne.s32.totalorder %s3458_s29, 0 }
  0xc5   : > { %s3116_s27 = scalar_lea.vmem [#allocation7], %s2379_s2 }
  0xc6   : > { %2788 = dma.done.wait (%p3480_p11), %s327_s30, 2560  }
  0xc7   : > { %2790 = vsyncadd (%p3480_p11), %s327_s30, 4294964736  ;;  %s1960_s24 = sshll.u32 %s328_s11, 6  ;;  %p3481_p3 = pmov %p3479_p0 }
  0xc8   : > { %s3122_s14 = scalar_lea.vmem [#allocation8], %s1960_s24 }
  0xc9   : > { %2792 = dma.done.wait (%p3481_p3), [#allocation6], 2048   ;;  %p3482_p7 = pmov %p3479_p0 }
  0xca   : > { %p3483_p1 = pmov %p3479_p0 }
  0xcb   : > { %2794 = vsyncadd (%p3482_p7), [#allocation6], 4294965248 }
  0xcc   : > { %2796 = dma.done.wait (%p3483_p1), [#allocation11], 2048   ;;  %p3484_p10 = pmov %p3479_p0 }
  0xcd   : > { %p3485_p13 = scmp.ne.s32.totalorder %s2894_s28, 0 }
  0xce   : > { %2798 = vsyncadd (%p3484_p10), [#allocation11], 4294965248  ;;  %v382_v0 = vld [vmem:[#allocation2] sm:$0xff] (!%p3485_p13)  ;;  %v383_v1 = vld [vmem:[#allocation2 + $0x8] sm:$0xff] (!%p3485_p13) }
  0xcf   : > { %381 = sbr.rel (%p3485_p13) target bundleno = 214 (0xd6), region = 76  ;;  %v384_v2 = vld [vmem:[#allocation2 + $0x10] sm:$0xff] (!%p3485_p13)  ;;  %390 = vst [vmem:[#allocation12] sm:$0xff] (!%p3485_p13), %v382_v0  ;;  %391 = vst [vmem:[#allocation12 + $0x8] sm:$0xff] (!%p3485_p13), %v383_v1  ;;  %v385_v3 = vld [vmem:[#allocation2 + $0x18] sm:$0xff] (!%p3485_p13) }
  0xd0   : > { %392 = vst [vmem:[#allocation12 + $0x10] sm:$0xff] (!%p3485_p13), %v384_v2  ;;  %v386_v4 = vld [vmem:[#allocation2 + $0x20] sm:$0xff] (!%p3485_p13)  ;;  %v387_v5 = vld [vmem:[#allocation2 + $0x28] sm:$0xff] (!%p3485_p13)  ;;  %393 = vst [vmem:[#allocation12 + $0x18] sm:$0xff] (!%p3485_p13), %v385_v3 }
  0xd1   : > { %394 = vst [vmem:[#allocation12 + $0x20] sm:$0xff] (!%p3485_p13), %v386_v4  ;;  %395 = vst [vmem:[#allocation12 + $0x28] sm:$0xff] (!%p3485_p13), %v387_v5  ;;  %v388_v6 = vld [vmem:[#allocation2 + $0x30] sm:$0xff] (!%p3485_p13)  ;;  %v389_v7 = vld [vmem:[#allocation2 + $0x38] sm:$0xff] (!%p3485_p13) }
  0xd2   : > { %396 = vst [vmem:[#allocation12 + $0x30] sm:$0xff] (!%p3485_p13), %v388_v6  ;;  %397 = vst [vmem:[#allocation12 + $0x38] sm:$0xff] (!%p3485_p13), %v389_v7 }
  0xd6 PF: > { %v407_v8 = vld [vmem:[%s3116_s27 + $0x8] sm:$0xff]  ;;  %v410_v9 = vld [vmem:[%s3116_s27 + $0x20] sm:$0xff]  ;;  %v409_v12 = vld [vmem:[%s3116_s27 + $0x18] sm:$0xff]  ;;  %v2831_v15 = vmov 0.0   ;;  %vm418_vm0 = vcmask 261120   ;;  %vm677_vm1 = vcmask 523264  }
  0xd7   : > { %v406_v10 = vld [vmem:[%s3116_s27] sm:$0xff]  ;;  %v2221_v11 = vpack.c.bf16 %v410_v9, %v407_v8  ;;  %v413_v13 = vld [vmem:[%s3116_s27 + $0x38] sm:$0xff]  ;;  %v416_v14 = vld [vmem:[%s3116_s27 + $0x50] sm:$0xff]  ;;  %507 = vmatprep.mubr.f32.mxu1 %v2831_v15  ;;  %1203 = vmatprep.mubr.f32.mxu0 %v2831_v15  ;;  %s2832_s18 = smov [#allocation12]   ;;  %p2433_p2 = scmp.eq.s32.totalorder %s2894_s28, 1 }
  0xd8   : > { %v2223_v16 = vpack.c.bf16 %v409_v12, %v406_v10  ;;  %v2225_v17 = vpack.c.bf16 %v416_v14, %v413_v13  ;;  %v412_v18 = vld [vmem:[%s3116_s27 + $0x30] sm:$0xff]  ;;  %v415_v19 = vld [vmem:[%s3116_s27 + $0x48] sm:$0xff]  ;;  %v414_v24 = vld [vmem:[%s3116_s27 + $0x40] sm:$0xff]  ;;  %s1835_s15 = sshll.u32 %s2832_s18, 4  ;;  %s1836_s15 = int_to_ptr.vmem [resolvable:$true] %s1835_s15 }
  0xd9   : > { %2222 = vmatprep.subr.bf16.mxu1 %v2221_v11  ;;  %v2227_v20 = vpack.c.bf16 %v415_v19, %v412_v18  ;;  %v408_v21 = vld [vmem:[%s3116_s27 + $0x10] sm:$0xff]  ;;  %v411_v22 = vld [vmem:[%s3116_s27 + $0x28] sm:$0xff]  ;;  %v417_v25 = vld [vmem:[%s3116_s27 + $0x58] sm:$0xff]  ;;  %s2737_s9 = scalar_lea.vmem %s1836_s15, 1024  ;;  %p2744_p6 = scmp.lt.s32.totalorder %s1836_s15, %s1836_s15 }
  0xda   : > { %2224 = vmatpush1.bf16.msra.mxu1 %v2223_v16  ;;  %v2229_v23 = vpack.c.bf16 %v411_v22, %v408_v21  ;;  %v3148_v26 = vld [vmem:[#allocation12] sm:$0xff]  ;;  %v2233_v27 = vpack.c.bf16 %v417_v25, %v414_v24  ;;  %v3153_v28 = vld [vmem:[#allocation12 + $0x8] sm:$0xff]  ;;  %v3158_v29 = vld [vmem:[#allocation12 + $0x10] sm:$0xff]  ;;  %p2738_p8 = scmp.ne.s32.totalorder %s1836_s15, %s2737_s9  ;;  %p2745_p9 = scmp.lt.s32.totalorder %s2737_s9, %s2737_s9 }
  0xdb   : > { %2226 = vmatprep.subr.bf16.mxu1 %v2225_v17  ;;  %v3163_v30 = vld [vmem:[#allocation12 + $0x18] sm:$0xff]  ;;  %v3168_v31 = vld [vmem:[#allocation12 + $0x20] sm:$0xff]  ;;  %v3173_v32 = vld [vmem:[#allocation12 + $0x28] sm:$0xff] }
  0xdc   : > { %v3178_v33 = vld [vmem:[#allocation12 + $0x30] sm:$0xff]  ;;  %v3183_v34 = vld [vmem:[#allocation12 + $0x38] sm:$0xff]  ;;  %v669_v35 = vld [vmem:[#allocation5] sm:$0xff]  ;;  %p2739_p5 = pnand %p2738_p8, %p2433_p2  ;;  %p2746_p12 = por %p2745_p9, %p2744_p6 }
  0xdd   : > { %v1124_v36 = vld [vmem:[#allocation10 + $0x8] sm:$0xff]  ;;  %v1123_v38 = vld [vmem:[#allocation10] sm:$0xff]  ;;  %v1126_v47 = vld [vmem:[#allocation10 + $0x18] sm:$0xff] }
  0xde   : > { %2228 = vmatpush1.bf16.msra.mxu1 %v2227_v20  ;;  %v1128_v37 = vld [vmem:[#allocation10 + $0x28] sm:$0xff]  ;;  %v1127_v40 = vld [vmem:[#allocation10 + $0x20] sm:$0xff]  ;;  %v1130_v48 = vld [vmem:[#allocation10 + $0x38] sm:$0xff]  ;;  %p2740_p4 = pneg %p2739_p5 }
  0xdf   : > { %2230 = vmatprep.subr.bf16.mxu1 %v2229_v23  ;;  %v3204_v39 = vpack.c.bf16 %v1128_v37, %v1124_v36  ;;  %v1132_v41 = vld [vmem:[#allocation10 + $0x48] sm:$0xff]  ;;  %v3206_v43 = vpack.c.bf16 %v1127_v40, %v1123_v38  ;;  %v1131_v45 = vld [vmem:[#allocation10 + $0x40] sm:$0xff]  ;;  %v2293_v50 = vpack.c.bf16 %v1130_v48, %v1126_v47  ;;  %v1125_v51 = vld [vmem:[#allocation10 + $0x10] sm:$0xff] }
  0xe0   : > { %v1136_v42 = vld [vmem:[#allocation10 + $0x68] sm:$0xff]  ;;  %v1135_v46 = vld [vmem:[#allocation10 + $0x60] sm:$0xff]  ;;  %v1129_v52 = vld [vmem:[#allocation10 + $0x30] sm:$0xff]  ;;  %p2747_p0 = pnand %p2746_p12, %p2740_p4 }
  0xe1   : > { %1964 = vmatmul.mubr.msk.f32.vlgmr.msra.gmra.mrb[0].mxu1 %vm418_vm0, %v3148_v26  ;;  %v3208_v44 = vpack.c.bf16 %v1136_v42, %v1132_v41  ;;  %2286 = vmatprep.subr.bf16.mxu0 %v3204_v39  ;;  %v3212_v49 = vpack.c.bf16 %v1135_v46, %v1131_v45  ;;  %v1134_v53 = vld [vmem:[#allocation10 + $0x58] sm:$0xff]  ;;  %v2295_v55 = vpack.c.bf16 %v1129_v52, %v1125_v51  ;;  %v1133_v57 = vld [vmem:[#allocation10 + $0x50] sm:$0xff]  ;;  %v1108_v59 = vld [vmem:[#allocation9 + $0x8] sm:$0xff] }
  0xe2   : > { %513 = vmatprep.mubr.f32.mxu1 %v2831_v15  ;;  %2232 = vmatpush3.bf16.msra.mxu1 %v2229_v23  ;;  %v1138_v54 = vld [vmem:[#allocation10 + $0x78] sm:$0xff]  ;;  %v1137_v58 = vld [vmem:[#allocation10 + $0x70] sm:$0xff]  ;;  %v1112_v60 = vld [vmem:[#allocation9 + $0x28] sm:$0xff] }
  0xe3   : > { %2234 = vmatprep.subr.bf16.mxu1 %v2233_v27  ;;  %2288 = vmatpush1.bf16.msra.mxu0 %v3206_v43  ;;  %v2297_v56 = vpack.c.bf16 %v1138_v54, %v1134_v53  ;;  %v2299_v61 = vpack.c.bf16 %v1137_v58, %v1133_v57  ;;  %v2301_v62 = vpack.c.bf16 %v1112_v60, %v1108_v59  ;;  %v1107_v63 = vld [vmem:[#allocation9] sm:$0xff]  ;;  %v1116_v1 = vld [vmem:[#allocation9 + $0x48] sm:$0xff]  ;;  %v671_v46 = vld [vmem:[#allocation5 + $0x10] sm:$0xff] }
  0xe4   : > { %2290 = vmatprep.subr.bf16.mxu0 %v3208_v44  ;;  %v1111_v0 = vld [vmem:[#allocation9 + $0x20] sm:$0xff]  ;;  %v1120_v2 = vld [vmem:[#allocation9 + $0x68] sm:$0xff]  ;;  %v675_v57 = vld [vmem:[#allocation5 + $0x30] sm:$0xff] }
  0xe5   : > { %1965 = vmatmul.mubr.msk.f32.gmra.mrb[2].mxu1 %vm418_vm0, %v3153_v28  ;;  %v2303_v3 = vpack.c.bf16 %v1111_v0, %v1107_v63  ;;  %v2305_v4 = vpack.c.bf16 %v1120_v2, %v1116_v1  ;;  %v1115_v5 = vld [vmem:[#allocation9 + $0x40] sm:$0xff]  ;;  %v670_v42 = vld [vmem:[#allocation5 + $0x8] sm:$0xff]  ;;  %v676_v60 = vld [vmem:[#allocation5 + $0x38] sm:$0xff] }
  0xe6   : > { %519 = vmatprep.mubr.f32.mxu1 %v2831_v15  ;;  %2236 = vmatpush3.bf16.msra.mxu1 %v2233_v27  ;;  %v1119_v6 = vld [vmem:[#allocation9 + $0x60] sm:$0xff]  ;;  %v817_v1 = vld [vmem:[#allocation5 + $0x48] sm:$0xff]  ;;  %v818_v2 = vld [vmem:[#allocation5 + $0x50] sm:$0xff] }
  0xe7   : > { %2292 = vmatpush1.bf16.msra.mxu0 %v3212_v49  ;;  %v2307_v7 = vpack.c.bf16 %v1119_v6, %v1115_v5  ;;  %v673_v52 = vld [vmem:[#allocation5 + $0x20] sm:$0xff]  ;;  %v821_v5 = vld [vmem:[#allocation5 + $0x68] sm:$0xff]  ;;  %v822_v6 = vld [vmem:[#allocation5 + $0x70] sm:$0xff] }
  0xe8   : > { %2294 = vmatprep.subr.bf16.mxu0 %v2293_v50  ;;  %v672_v50 = vld [vmem:[#allocation5 + $0x18] sm:$0xff] }
  0xe9   : > { %1966 = vmatmul.mubr.msk.f32.gmra.mrb[4].mxu1 %vm418_vm0, %v3158_v29 }
  0xea   : > { %525 = vmatprep.mubr.f32.mxu1 %v2831_v15  ;;  %2004 = vmatmul.mubr.msk.f32.vlgmr.msra.gmra.mrb[0].mxu0 %vm418_vm0, %v3148_v26 }
  0xeb   : > { %2296 = vmatpush1.bf16.msra.mxu0 %v2295_v55  ;;  %1209 = vmatprep.mubr.f32.mxu0 %v2831_v15  ;;  %v674_v55 = vld [vmem:[#allocation5 + $0x28] sm:$0xff] }
  0xec   : > { %2298 = vmatprep.subr.bf16.mxu0 %v2297_v56 }
  0xed   : > { %1967 = vmatmul.mubr.msk.f32.gmra.mrb[6].mxu1 %vm418_vm0, %v3163_v30 }
  0xee   : > { %531 = vmatprep.mubr.f32.mxu1 %v2831_v15  ;;  %2005 = vmatmul.mubr.msk.f32.gmra.mrb[2].mxu0 %vm418_vm0, %v3153_v28 }
  0xef   : > { %1215 = vmatprep.mubr.f32.mxu0 %v2831_v15  ;;  %2300 = vmatpush1.bf16.msra.mxu0 %v2299_v61 }
  0xf0   : > { %2302 = vmatprep.subr.bf16.mxu0 %v2301_v62  ;;  %v816_v62 = vld [vmem:[#allocation5 + $0x40] sm:$0xff] }
  0xf1   : > { %1968 = vmatmul.mubr.msk.f32.gmra.mrb[8].mxu1 %vm418_vm0, %v3168_v31 }
  0xf2   : > { %537 = vmatprep.mubr.f32.mxu1 %v2831_v15  ;;  %2006 = vmatmul.mubr.msk.f32.gmra.mrb[4].mxu0 %vm418_vm0, %v3158_v29 }
  0xf3   : > { %1221 = vmatprep.mubr.f32.mxu0 %v2831_v15 }
  0xf5   : > { %1969 = vmatmul.mubr.msk.f32.gmra.mrb[10].mxu1 %vm418_vm0, %v3173_v32 }
  0xf6   : > { %543 = vmatprep.mubr.f32.mxu1 %v2831_v15  ;;  %2007 = vmatmul.mubr.msk.f32.gmra.mrb[6].mxu0 %vm418_vm0, %v3163_v30 }
  0xf7   : > { %1316 = vmatprep.mubr.f32.mxu0 %v2831_v15 }
  0xf9   : > { %1970 = vmatmul.mubr.msk.f32.gmra.mrb[12].mxu1 %vm418_vm0, %v3178_v33 }
  0xfa   : > { %549 = vmatprep.mubr.f32.mxu1 %v2831_v15  ;;  %2012 = vmatmul.mubr.msk.f32.vlgmr.msra.gmra.mrb[8].mxu0 %vm418_vm0, %v3148_v26 }
  0xfb   : > { %2304 = vmatpush1.bf16.msra.mxu0 %v2303_v3  ;;  %1322 = vmatprep.mubr.f32.mxu0 %v2831_v15  ;;  %v819_v3 = vld [vmem:[#allocation5 + $0x58] sm:$0xff] }
  0xfc   : > { %2306 = vmatprep.subr.bf16.mxu0 %v2305_v4  ;;  %v820_v4 = vld [vmem:[#allocation5 + $0x60] sm:$0xff] }
  0xfd   : > { %1971 = vmatmul.mubr.msk.f32.gmra.mrb[14].mxu1 %vm418_vm0, %v3183_v34 }
  0xfe   : > { %2125 = vmatprep.mubr.msk.f32.mxu1 %vm418_vm0, %v3148_v26  ;;  %2013 = vmatmul.mubr.msk.f32.gmra.mrb[10].mxu0 %vm418_vm0, %v3153_v28 }
  0xff   : > { %1328 = vmatprep.mubr.f32.mxu0 %v2831_v15  ;;  %2308 = vmatpush1.bf16.msra.mxu0 %v2307_v7  ;;  %v823_v7 = vld [vmem:[#allocation5 + $0x78] sm:$0xff] }
 0x101   : > { %2126 = vmatmul.mubr.msk.f32.vlgmr.msra.gmra.mrb[16].mxu1 %vm418_vm0, %v3153_v28 }
 0x102   : > { %2128 = vmatprep.mubr.msk.f32.mxu1 %vm418_vm0, %v3158_v29  ;;  %2014 = vmatmul.mubr.msk.f32.gmra.mrb[12].mxu0 %vm418_vm0, %v3158_v29 }
 0x103   : > { %1334 = vmatprep.mubr.f32.mxu0 %v2831_v15 }
 0x105   : > { %2129 = vmatmul.mubr.msk.f32.gmra.mrb[18].mxu1 %vm418_vm0, %v3163_v30 }
 0x106   : > { %2131 = vmatprep.mubr.msk.f32.mxu1 %vm418_vm0, %v3168_v31  ;;  %2015 = vmatmul.mubr.msk.f32.gmra.mrb[14].mxu0 %vm418_vm0, %v3163_v30 }
 0x107   : > { %1340 = vmatprep.mubr.f32.mxu0 %v2831_v15 }
 0x109   : > { %2132 = vmatmul.mubr.msk.f32.gmra.mrb[20].mxu1 %vm418_vm0, %v3173_v32 }
 0x10a   : > { %2134 = vmatprep.mubr.msk.f32.mxu1 %vm418_vm0, %v3178_v33  ;;  %2016 = vmatmul.mubr.msk.f32.gmra.mrb[16].mxu0 %vm418_vm0, %v3168_v31 }
 0x10b   : > { %1346 = vmatprep.mubr.f32.mxu0 %v2831_v15 }
 0x10d   : > { %2135 = vmatmul.mubr.msk.f32.gmra.mrb[22].mxu1 %vm418_vm0, %v3183_v34 }
 0x10e   : > { %2153 = vmatprep.mubr.msk.f32.mxu1 %vm677_vm1, %v669_v35  ;;  %2017 = vmatmul.mubr.msk.f32.gmra.mrb[18].mxu0 %vm418_vm0, %v3173_v32 }
 0x10f   : > { %1352 = vmatprep.mubr.f32.mxu0 %v2831_v15 }
 0x112   : > { %2018 = vmatmul.mubr.msk.f32.gmra.mrb[20].mxu0 %vm418_vm0, %v3178_v33 }
 0x113   : > { %1358 = vmatprep.mubr.f32.mxu0 %v2831_v15 }
 0x116   : > { %2019 = vmatmul.mubr.msk.f32.gmra.mrb[22].mxu0 %vm418_vm0, %v3183_v34 }
 0x117   : > { %1453 = vmatprep.mubr.f32.mxu0 %v2831_v15 }
 0x1b4   : > { %v509_v8 = vpop.f32.mrb[0].mxu1 }
 0x1b5   : > { %v511_v9 = vpop.f32.mrb[1].mxu1 }
 0x1b8   : > { %v515_v10 = vpop.f32.mrb[2].mxu1 }
 0x1b9   : > { %v2237_v11 = vpack.c.bf16 %v515_v10, %v509_v8  ;;  %v517_v12 = vpop.f32.mrb[3].mxu1  ;;  %v962_v8 = vld [vmem:[#allocation5 + $0x80] sm:$0xff]  ;;  %v964_v10 = vld [vmem:[#allocation5 + $0x90] sm:$0xff] }
 0x1ba   : > { %v2253_v13 = vpack.c.bf16 %v517_v12, %v511_v9  ;;  %v963_v9 = vld [vmem:[#allocation5 + $0x88] sm:$0xff]  ;;  %v966_v12 = vld [vmem:[#allocation5 + $0xa0] sm:$0xff] }
 0x1bb   : > { %2238 = vmatprep.subr.bf16.mxu1 %v2237_v11 }
 0x1bc   : > { %v521_v14 = vpop.f32.mrb[4].mxu1  ;;  %2240 = vmatpush3.bf16.msra.mxu1 %v2237_v11  ;;  %v965_v11 = vld [vmem:[#allocation5 + $0x98] sm:$0xff] }
 0x1bd   : > { %v523_v16 = vpop.f32.mrb[5].mxu1 }
 0x1c0   : > { %v527_v17 = vpop.f32.mrb[6].mxu1 }
 0x1c1   : > { %v2241_v18 = vpack.c.bf16 %v527_v17, %v521_v14  ;;  %v529_v19 = vpop.f32.mrb[7].mxu1  ;;  %v968_v14 = vld [vmem:[#allocation5 + $0xb0] sm:$0xff]  ;;  %v661_v17 = vld [vmem:[%s3122_s14] sm:$0xff] }
 0x1c2   : > { %v2257_v20 = vpack.c.bf16 %v529_v19, %v523_v16  ;;  %v1113_v16 = vld [vmem:[#allocation9 + $0x30] sm:$0xff] }
 0x1c3   : > { %2242 = vmatprep.subr.bf16.mxu1 %v2241_v18 }
 0x1c4   : > { %v533_v21 = vpop.f32.mrb[8].mxu1  ;;  %2244 = vmatpush3.bf16.msra.mxu1 %v2241_v18  ;;  %v1118_v18 = vld [vmem:[#allocation9 + $0x58] sm:$0xff] }
 0x1c5   : > { %v535_v22 = vpop.f32.mrb[9].mxu1 }
 0x1c8   : > { %v539_v23 = vpop.f32.mrb[10].mxu1 }
 0x1c9   : > { %v2245_v24 = vpack.c.bf16 %v539_v23, %v533_v21  ;;  %v541_v25 = vpop.f32.mrb[11].mxu1  ;;  %v1117_v23 = vld [vmem:[#allocation9 + $0x50] sm:$0xff] }
 0x1ca   : > { %v2261_v27 = vpack.c.bf16 %v541_v25, %v535_v22  ;;  %v662_v25 = vld [vmem:[%s3122_s14 + $0x8] sm:$0xff] }
 0x1cb   : > { %2246 = vmatprep.subr.bf16.mxu1 %v2245_v24 }
 0x1cc   : > { %v545_v35 = vpop.f32.mrb[12].mxu1  ;;  %2248 = vmatpush3.bf16.msra.mxu1 %v2245_v24  ;;  %v1121_v24 = vld [vmem:[#allocation9 + $0x70] sm:$0xff] }
 0x1cd   : > { %v547_v36 = vpop.f32.mrb[13].mxu1 }
 0x1d0   : > { %v551_v37 = vpop.f32.mrb[14].mxu1 }
 0x1d1   : > { %v2249_v38 = vpack.c.bf16 %v551_v37, %v545_v35  ;;  %v553_v40 = vpop.f32.mrb[15].mxu1  ;;  %v2315_v35 = vpack.c.bf16 %v1121_v24, %v1117_v23  ;;  %v663_v37 = vld [vmem:[%s3122_s14 + $0x10] sm:$0xff] }
 0x1d2   : > { %v2265_v41 = vpack.c.bf16 %v553_v40, %v547_v36 }
 0x1d3   : > { %2250 = vmatprep.subr.bf16.mxu1 %v2249_v38 }
 0x1d4   : > { %2252 = vmatpush3.bf16.msra.mxu1 %v2249_v38  ;;  %v2127_v45 = vpop.f32.mrb[16].mxu1 }
 0x1d5   : > { %2254 = vmatprep.subr.bf16.mxu1 %v2253_v13  ;;  %v622_v47 = vpop.f32.mrb[17].mxu1 }
 0x1d6   : > { %v2269_v48 = vpack.c.bf16 %v2127_v45, %v622_v47 }
 0x1d7   : > { %2154 = vmatmul.mubr.msk.f32.vlgmr.msra.gmra.mrb[24].mxu1 %vm677_vm1, %v670_v42  ;;  %v664_v42 = vld [vmem:[%s3122_s14 + $0x18] sm:$0xff] }
 0x1d8   : > { %2256 = vmatpush3.bf16.msra.mxu1 %v2253_v13  ;;  %2156 = vmatprep.mubr.msk.f32.mxu1 %vm677_vm1, %v671_v46  ;;  %v2130_v51 = vpop.f32.mrb[18].mxu1  ;;  %v967_v13 = vld [vmem:[#allocation5 + $0xa8] sm:$0xff] }
 0x1d9   : > { %2258 = vmatprep.subr.bf16.mxu1 %v2257_v20  ;;  %v632_v53 = vpop.f32.mrb[19].mxu1 }
 0x1da   : > { %v2273_v54 = vpack.c.bf16 %v2130_v51, %v632_v53  ;;  %v666_v51 = vld [vmem:[%s3122_s14 + $0x28] sm:$0xff]  ;;  %v667_v53 = vld [vmem:[%s3122_s14 + $0x30] sm:$0xff] }
 0x1db   : > { %2157 = vmatmul.mubr.msk.f32.gmra.mrb[26].mxu1 %vm677_vm1, %v672_v50 }
 0x1dc   : > { %2260 = vmatpush3.bf16.msra.mxu1 %v2257_v20  ;;  %2159 = vmatprep.mubr.msk.f32.mxu1 %vm677_vm1, %v673_v52  ;;  %v2133_v56 = vpop.f32.mrb[20].mxu1 }
 0x1dd   : > { %2262 = vmatprep.subr.bf16.mxu1 %v2261_v27  ;;  %v642_v58 = vpop.f32.mrb[21].mxu1 }
 0x1de   : > { %v2277_v59 = vpack.c.bf16 %v2133_v56, %v642_v58 }
 0x1df   : > { %2160 = vmatmul.mubr.msk.f32.gmra.mrb[28].mxu1 %vm677_vm1, %v674_v55  ;;  %v668_v55 = vld [vmem:[%s3122_s14 + $0x38] sm:$0xff] }
 0x1e0   : > { %2264 = vmatpush3.bf16.msra.mxu1 %v2261_v27  ;;  %2162 = vmatprep.mubr.msk.f32.mxu1 %vm677_vm1, %v675_v57  ;;  %v2136_v61 = vpop.f32.mrb[22].mxu1 }
 0x1e1   : > { %2266 = vmatprep.subr.bf16.mxu1 %v2265_v41  ;;  %v652_v63 = vpop.f32.mrb[23].mxu1 }
 0x1e2   : > { %v2281_v0 = vpack.c.bf16 %v2136_v61, %v652_v63 }
 0x1e3   : > { %2163 = vmatmul.mubr.msk.f32.gmra.mrb[30].mxu1 %vm677_vm1, %v676_v60 }
 0x1e4   : > { %2268 = vmatpush3.bf16.msra.mxu1 %v2265_v41  ;;  %2181 = vmatprep.mubr.msk.f32.mxu1 %vm677_vm1, %v816_v62 }
 0x1e5   : > { %2270 = vmatprep.subr.bf16.mxu1 %v2269_v48 }
 0x1e7   : > { %2182 = vmatmul.mubr.msk.f32.vlgmr.msra.gmra.mrb[24].mxu1 %vm677_vm1, %v817_v1  ;;  %v1617_v1 = vlaneseq }
 0x1e8   : > { %2272 = vmatpush3.bf16.msra.mxu1 %v2269_v48  ;;  %2184 = vmatprep.mubr.msk.f32.mxu1 %vm677_vm1, %v818_v2  ;;  %v665_v48 = vld [vmem:[%s3122_s14 + $0x20] sm:$0xff] }
 0x1e9   : > { %2274 = vmatprep.subr.bf16.mxu1 %v2273_v54  ;;  %v3336_v2 = vshrl.u32 %v1617_v1, 7 }
 0x1eb   : > { %2185 = vmatmul.mubr.msk.f32.gmra.mrb[26].mxu1 %vm677_vm1, %v819_v3  ;;  %v1619_v3 = vsub.s32 0, %v3336_v2  ;;  %v1627_v1 = vsub.s32 2, %v3336_v2 }
 0x1ec   : > { %2276 = vmatpush3.bf16.msra.mxu1 %v2273_v54  ;;  %2187 = vmatprep.mubr.msk.f32.mxu1 %vm677_vm1, %v820_v4 }
 0x1ed   : > { %2278 = vmatprep.subr.bf16.mxu1 %v2277_v59 }
 0x1ef   : > { %2188 = vmatmul.mubr.msk.f32.gmra.mrb[28].mxu1 %vm677_vm1, %v821_v5 }
 0x1f0   : > { %2280 = vmatpush3.bf16.msra.mxu1 %v2277_v59  ;;  %2190 = vmatprep.mubr.msk.f32.mxu1 %vm677_vm1, %v822_v6 }
 0x1f1   : > { %2282 = vmatprep.subr.bf16.mxu1 %v2281_v0 }
 0x1f3   : > { %2191 = vmatmul.mubr.msk.f32.gmra.mrb[30].mxu1 %vm677_vm1, %v823_v7 }
 0x1f4   : > { %2284 = vmatpush3.bf16.msra.mxu1 %v2281_v0  ;;  %2209 = vmatprep.mubr.msk.f32.mxu1 %vm677_vm1, %v962_v8  ;;  %v1623_v8 = vsub.s32 1, %v3336_v2 }
 0x1f5   : > { %2317 = vmatprep.subr.bf16.mxu1 %v3204_v39  ;;  %v969_v39 = vld [vmem:[#allocation5 + $0xb8] sm:$0xff] }
 0x1f7   : > { %2210 = vmatmul.mubr.msk.f32.vlgmr.msra.gmra.mrb[24].mxu1 %vm677_vm1, %v963_v9 }
 0x1f8   : > { %2212 = vmatprep.mubr.msk.f32.mxu1 %vm677_vm1, %v964_v10  ;;  %2319 = vmatpush1.bf16.msra.mxu1 %v3206_v43  ;;  %v1110_v43 = vld [vmem:[#allocation9 + $0x18] sm:$0xff] }
 0x1f9   : > { %2318 = vmatprep.subr.bf16.mxu1 %v3208_v44  ;;  %v1114_v44 = vld [vmem:[#allocation9 + $0x38] sm:$0xff] }
 0x1fb   : > { %2213 = vmatmul.mubr.msk.f32.gmra.mrb[26].mxu1 %vm677_vm1, %v965_v11 }
 0x1fc   : > { %2215 = vmatprep.mubr.msk.f32.mxu1 %vm677_vm1, %v966_v12  ;;  %2320 = vmatpush1.bf16.msra.mxu1 %v3212_v49  ;;  %v2309_v49 = vpack.c.bf16 %v1114_v44, %v1110_v43 }
 0x1fe   : > { %2310 = vmatprep.subr.bf16.mxu0 %v2309_v49 }
 0x1ff   : > { %2216 = vmatmul.mubr.msk.f32.gmra.mrb[28].mxu1 %vm677_vm1, %v967_v13 }
 0x200   : > { %2218 = vmatprep.mubr.msk.f32.mxu1 %vm677_vm1, %v968_v14 }
 0x203   : > { %2219 = vmatmul.mubr.msk.f32.gmra.mrb[30].mxu1 %vm677_vm1, %v969_v39 }
 0x204   : > { %1227 = vmatprep.mubr.f32.mxu1 %v2831_v15 }
 0x207   : > { %2008 = vmatmul.mubr.msk.f32.vlgmr.msra.gmra.mrb[32].mxu1 %vm418_vm0, %v3168_v31  ;;  %v1109_v31 = vld [vmem:[#allocation9 + $0x10] sm:$0xff] }
 0x208   : > { %1233 = vmatprep.mubr.f32.mxu1 %v2831_v15  ;;  %v2311_v21 = vpack.c.bf16 %v1113_v16, %v1109_v31 }
 0x20b   : > { %2009 = vmatmul.mubr.msk.f32.gmra.mrb[34].mxu1 %vm418_vm0, %v3173_v32  ;;  %v1122_v32 = vld [vmem:[#allocation9 + $0x78] sm:$0xff] }
 0x20c   : > { %1239 = vmatprep.mubr.f32.mxu1 %v2831_v15  ;;  %v2313_v22 = vpack.c.bf16 %v1122_v32, %v1118_v18 }
 0x20f   : > { %2010 = vmatmul.mubr.msk.f32.gmra.mrb[36].mxu1 %vm418_vm0, %v3178_v33 }
 0x210   : > { %1245 = vmatprep.mubr.f32.mxu1 %v2831_v15 }
 0x213   : > { %2011 = vmatmul.mubr.msk.f32.gmra.mrb[38].mxu1 %vm418_vm0, %v3183_v34 }
 0x2ca   : > { %v2211_v19 = vpop.f32.mrb[24].mxu1 }
 0x2cb   : > { %v1060_v20 = vpop.f32.mrb[25].mxu1  ;;  %v2321_v36 = vadd.f32 %v2211_v19, %v662_v25 }
 0x2cc   : > { %v2322_v33 = vadd.f32 %v1060_v20, %v661_v17 }
 0x2ce   : > { %v2214_v34 = vpop.f32.mrb[26].mxu1  ;;  %2020 = vmatmul.mubr.msk.f32.vlgmr.msra.gmra.mrb[0].mxu0 %vm418_vm0, %v2322_v33 }
 0x2cf   : > { %v1070_v27 = vpop.f32.mrb[27].mxu1  ;;  %2312 = vmatpush1.bf16.msra.mxu0 %v2311_v21  ;;  %1459 = vmatprep.mubr.f32.mxu0 %v2831_v15  ;;  %v2323_v47 = vadd.f32 %v2214_v34, %v664_v42 }
 0x2d0   : > { %2314 = vmatprep.subr.bf16.mxu0 %v2313_v22  ;;  %v2324_v41 = vadd.f32 %v1070_v27, %v663_v37 }
 0x2d2   : > { %v2217_v38 = vpop.f32.mrb[28].mxu1  ;;  %2021 = vmatmul.mubr.msk.f32.gmra.mrb[2].mxu0 %vm418_vm0, %v2321_v36 }
 0x2d3   : > { %v1080_v40 = vpop.f32.mrb[29].mxu1  ;;  %1465 = vmatprep.mubr.f32.mxu0 %v2831_v15  ;;  %2316 = vmatpush1.bf16.msra.mxu0 %v2315_v35  ;;  %v2325_v52 = vadd.f32 %v2217_v38, %v666_v51 }
 0x2d4   : > { %v2326_v50 = vadd.f32 %v1080_v40, %v665_v48 }
 0x2d6   : > { %v2220_v45 = vpop.f32.mrb[30].mxu1  ;;  %2022 = vmatmul.mubr.msk.f32.gmra.mrb[4].mxu0 %vm418_vm0, %v2324_v41 }
 0x2d7   : > { %v1090_v46 = vpop.f32.mrb[31].mxu1  ;;  %1471 = vmatprep.mubr.f32.mxu0 %v2831_v15  ;;  %v2327_v56 = vadd.f32 %v2220_v45, %v668_v55 }
 0x2d8   : > { %v2328_v54 = vadd.f32 %v1090_v46, %v667_v53 }
 0x2da   : > { %2023 = vmatmul.mubr.msk.f32.gmra.mrb[6].mxu0 %vm418_vm0, %v2323_v47  ;;  %v1229_v57 = vpop.f32.mrb[32].mxu1 }
 0x2db   : > { %1477 = vmatprep.mubr.f32.mxu0 %v2831_v15  ;;  %v1231_v58 = vpop.f32.mrb[33].mxu1 }
 0x2de   : > { %2024 = vmatmul.mubr.msk.f32.gmra.mrb[24].mxu0 %vm418_vm0, %v2326_v50  ;;  %v1235_v59 = vpop.f32.mrb[34].mxu1 }
 0x2df   : > { %1483 = vmatprep.mubr.f32.mxu0 %v2831_v15  ;;  %v1237_v60 = vpop.f32.mrb[35].mxu1 }
 0x2e2   : > { %2025 = vmatmul.mubr.msk.f32.gmra.mrb[26].mxu0 %vm418_vm0, %v2325_v52  ;;  %v1241_v61 = vpop.f32.mrb[36].mxu1 }
 0x2e3   : > { %1489 = vmatprep.mubr.f32.mxu0 %v2831_v15  ;;  %v3330_v62 = vpop.f32.mrb[37].mxu1 }
 0x2e6   : > { %2026 = vmatmul.mubr.msk.f32.gmra.mrb[28].mxu0 %vm418_vm0, %v2328_v54  ;;  %v3332_v63 = vpop.f32.mrb[38].mxu1 }
 0x2e7   : > { %1495 = vmatprep.mubr.f32.mxu0 %v2831_v15  ;;  %v3334_v0 = vpop.f32.mrb[39].mxu1 }
 0x2ea   : > { %2027 = vmatmul.mubr.msk.f32.gmra.mrb[30].mxu0 %vm418_vm0, %v2327_v56 }
 0x2eb   : > { %1566 = vmatprep.mubr.f32.mxu0 %v2831_v15 }
 0x2ee   : > { %2028 = vmatmul.mubr.msk.f32.vlgmr.msra.gmra.mrb[8].mxu0 %vm418_vm0, %v2322_v33 }
 0x2ef   : > { %1572 = vmatprep.mubr.f32.mxu0 %v2831_v15 }
 0x2f2   : > { %2029 = vmatmul.mubr.msk.f32.gmra.mrb[10].mxu0 %vm418_vm0, %v2321_v36 }
 0x2f3   : > { %1578 = vmatprep.mubr.f32.mxu0 %v2831_v15 }
 0x2f6   : > { %2030 = vmatmul.mubr.msk.f32.gmra.mrb[12].mxu0 %vm418_vm0, %v2324_v41 }
 0x2f7   : > { %1584 = vmatprep.mubr.f32.mxu0 %v2831_v15 }
 0x2fa   : > { %2031 = vmatmul.mubr.msk.f32.gmra.mrb[14].mxu0 %vm418_vm0, %v2323_v47 }
 0x2fb   : > { %1590 = vmatprep.mubr.f32.mxu0 %v2831_v15 }
 0x2fe   : > { %2032 = vmatmul.mubr.msk.f32.gmra.mrb[16].mxu0 %vm418_vm0, %v2326_v50  ;;  %v1631_v50 = vsub.s32 3, %v3336_v2 }
 0x2ff   : > { %1596 = vmatprep.mubr.f32.mxu0 %v2831_v15 }
 0x302   : > { %2033 = vmatmul.mubr.msk.f32.gmra.mrb[18].mxu0 %vm418_vm0, %v2325_v52 }
 0x303   : > { %1602 = vmatprep.mubr.f32.mxu0 %v2831_v15 }
 0x306   : > { %2034 = vmatmul.mubr.msk.f32.gmra.mrb[20].mxu0 %vm418_vm0, %v2328_v54 }
 0x307   : > { %1608 = vmatprep.mubr.f32.mxu0 %v2831_v15  ;;  %v3342_v15 = vld [vmem:[%s3440_s6] sm:$0xf] }
 0x308   : > { %v3345_v4 = vrot.slane %v3342_v15, %v1619_v3  ;;  %v3351_v13 = vrot.slane %v3342_v15, %v1623_v8 }
 0x30a   : > { %2035 = vmatmul.mubr.msk.f32.gmra.mrb[22].mxu0 %vm418_vm0, %v2327_v56 }
 0x3a1   : > { %v1455_v5 = vpop.f32.mrb[0].mxu0 }
 0x3a2   : > { %v1637_v6 = vadd.f32 %v3345_v4, %v1455_v5  ;;  %v1457_v7 = vpop.f32.mrb[1].mxu0 }
 0x3a3   : > { %v1638_v49 = vadd.f32 %v3351_v13, %v1457_v7 }
 0x3a4   : > { %v2036_v9 = vmul.f32 -1.442695, %v1637_v6 }
 0x3a5   : > { %v1461_v10 = vpop.f32.mrb[2].mxu0  ;;  %v2044_v19 = vmul.f32 -1.442695, %v1638_v49 }
 0x3a6   : > { %v1641_v11 = vadd.f32 %v3345_v4, %v1461_v10  ;;  %v1463_v12 = vpop.f32.mrb[3].mxu0  ;;  %2481 = vpow2.f32 %v2036_v9 }
 0x3a7   : > { %v1642_v32 = vadd.f32 %v3351_v13, %v1463_v12 }
 0x3a8   : > { %v2037_v39 = vmul.f32 -1.442695, %v1641_v11 }
 0x3a9   : > { %v1467_v14 = vpop.f32.mrb[4].mxu0  ;;  %v2045_v24 = vmul.f32 -1.442695, %v1642_v32 }
 0x3aa   : > { %v1645_v43 = vadd.f32 %v3345_v4, %v1467_v14  ;;  %v1469_v44 = vpop.f32.mrb[5].mxu0  ;;  %2483 = vpow2.f32 %v2037_v39 }
 0x3ab   : > { %v1646_v25 = vadd.f32 %v3351_v13, %v1469_v44 }
 0x3ac   : > { %v2038_v31 = vmul.f32 -1.442695, %v1645_v43  ;;  %v3374_v43 = vrot.slane %v3342_v15, %v1627_v1 }
 0x3ad   : > { %v1473_v16 = vpop.f32.mrb[6].mxu0  ;;  %v2046_v42 = vmul.f32 -1.442695, %v1646_v25 }
 0x3ae   : > { %v1649_v17 = vadd.f32 %v3345_v4, %v1473_v16  ;;  %v1475_v18 = vpop.f32.mrb[7].mxu0  ;;  %2485 = vpow2.f32 %v2038_v31 }
 0x3af   : > { %2487 = vpow2.f32 %v2044_v19  ;;  %v1650_v37 = vadd.f32 %v3351_v13, %v1475_v18 }
 0x3b0   : > { %v2039_v20 = vmul.f32 -1.442695, %v1649_v17  ;;  %v2482_v23 = vpop.eup %2481 }
 0x3b1   : > { %v1479_v21 = vpop.f32.mrb[24].mxu0  ;;  %v1693_v36 = vadd.f32 1.0, %v2482_v23  ;;  %v2047_v51 = vmul.f32 -1.442695, %v1650_v37 }
 0x3b2   : > { %v1480_v33 = vadd.f32 %v1479_v21, %v1229_v57  ;;  %v1481_v22 = vpop.f32.mrb[25].mxu0  ;;  %2489 = vpow2.f32 %v2039_v20 }
 0x3b3   : > { %v1482_v34 = vadd.f32 %v1481_v22, %v1231_v58  ;;  %2491 = vpow2.f32 %v2045_v24 }
 0x3b4   : > { %v1653_v27 = vadd.f32 %v3345_v4, %v1480_v33  ;;  %v2484_v46 = vpop.eup %2483 }
 0x3b5   : > { %v1485_v35 = vpop.f32.mrb[26].mxu0  ;;  %v1694_v56 = vadd.f32 1.0, %v2484_v46  ;;  %v1654_v57 = vadd.f32 %v3351_v13, %v1482_v34 }
 0x3b6   : > { %v2040_v38 = vmul.f32 -1.442695, %v1653_v27  ;;  %v1486_v40 = vadd.f32 %v1485_v35, %v1235_v59  ;;  %v1487_v41 = vpop.f32.mrb[27].mxu0 }
 0x3b7   : > { %v1488_v45 = vadd.f32 %v1487_v41, %v1237_v60  ;;  %v2048_v9 = vmul.f32 -1.442695, %v1654_v57 }
 0x3b8   : > { %v1657_v47 = vadd.f32 %v3345_v4, %v1486_v40  ;;  %2493 = vpow2.f32 %v2040_v38  ;;  %v2486_v55 = vpop.eup %2485 }
 0x3b9   : > { %v1491_v48 = vpop.f32.mrb[28].mxu0  ;;  %2495 = vrcp.f32 %v1693_v36  ;;  %v2488_v3 = vpop.eup %2487  ;;  %v1695_v5 = vadd.f32 1.0, %v2486_v55  ;;  %v1658_v10 = vadd.f32 %v3351_v13, %v1488_v45 }
 0x3ba   : > { %v2041_v52 = vmul.f32 -1.442695, %v1657_v47  ;;  %v1492_v53 = vadd.f32 %v1491_v48, %v1241_v61  ;;  %v1493_v54 = vpop.f32.mrb[29].mxu0  ;;  %2497 = vpow2.f32 %v2046_v42  ;;  %v1741_v14 = vadd.f32 1.0, %v2488_v3 }
 0x3bb   : > { %v1494_v58 = vadd.f32 %v1493_v54, %v3330_v62  ;;  %v3369_v62 = vrot.slane %v3342_v15, %v1631_v50  ;;  %v2049_v16 = vmul.f32 -1.442695, %v1658_v10 }
 0x3bc   : > { %v1661_v59 = vadd.f32 %v3345_v4, %v1492_v53  ;;  %2499 = vpow2.f32 %v2041_v52  ;;  %v2490_v8 = vpop.eup %2489 }
 0x3bd   : > { %v1497_v60 = vpop.f32.mrb[30].mxu0  ;;  %2501 = vpow2.f32 %v2047_v51  ;;  %v2492_v12 = vpop.eup %2491  ;;  %v1662_v17 = vadd.f32 %v3351_v13, %v1494_v58 }
 0x3be   : > { %v2042_v6 = vmul.f32 -1.442695, %v1661_v59  ;;  %v1498_v61 = vadd.f32 %v1497_v60, %v3332_v63  ;;  %v1499_v7 = vpop.f32.mrb[31].mxu0  ;;  %2503 = vrcp.f32 %v1694_v56  ;;  %v1696_v63 = vadd.f32 1.0, %v2490_v8 }
 0x3bf   : > { %v1500_v2 = vadd.f32 %v1499_v7, %v3334_v0  ;;  %v1742_v32 = vadd.f32 1.0, %v2492_v12  ;;  %v2050_v24 = vmul.f32 -1.442695, %v1662_v17 }
 0x3c0   : > { %2505 = vpow2.f32 %v2042_v6  ;;  %v1665_v11 = vadd.f32 %v3345_v4, %v1498_v61 }
 0x3c1   : > { %v1568_v39 = vpop.f32.mrb[8].mxu0  ;;  %2507 = vrcp.f32 %v1695_v5  ;;  %v1666_v19 = vadd.f32 %v3351_v13, %v1500_v2 }
 0x3c2   : > { %v2043_v44 = vmul.f32 -1.442695, %v1665_v11  ;;  %v1570_v49 = vpop.f32.mrb[9].mxu0  ;;  %v2494_v31 = vpop.eup %2493  ;;  %2509 = vpow2.f32 %v2048_v9  ;;  %v1639_v15 = vadd.f32 %v3374_v43, %v1568_v39 }
 0x3c3   : > { %v1640_v18 = vadd.f32 %v3369_v62, %v1570_v49  ;;  %v2496_v4 = vpop.eup %2495  ;;  %v1697_v33 = vadd.f32 1.0, %v2494_v31  ;;  %v2051_v37 = vmul.f32 -1.442695, %v1666_v19 }
 0x3c4   : > { %2511 = vpow2.f32 %v2043_v44  ;;  %v2498_v0 = vpop.eup %2497 }
 0x3c5   : > { %2513 = vrcp.f32 %v1741_v14  ;;  %v1765_v20 = vmul.f32 %v2496_v4, %v1640_v18  ;;  %v1574_v21 = vpop.f32.mrb[10].mxu0  ;;  %v1743_v27 = vadd.f32 1.0, %v2498_v0 }
 0x3c6   : > { %2515 = vrcp.f32 %v1696_v63  ;;  %v1576_v22 = vpop.f32.mrb[11].mxu0  ;;  %v2500_v23 = vpop.eup %2499  ;;  %v1643_v41 = vadd.f32 %v3374_v43, %v1574_v21 }
 0x3c7   : > { %2517 = vpow2.f32 %v2049_v16  ;;  %v1773_v25 = vadd.f32 %v1765_v20, %v1639_v15  ;;  %v2502_v34 = vpop.eup %2501  ;;  %v1644_v35 = vadd.f32 %v3369_v62, %v1576_v22  ;;  %v1698_v40 = vadd.f32 1.0, %v2500_v23 }
 0x3c8   : > { %2519 = vrcp.f32 %v1742_v32  ;;  %v2504_v36 = vpop.eup %2503  ;;  %v1744_v48 = vadd.f32 1.0, %v2502_v34 }
 0x3c9   : > { %2521 = vtanh.f32 %v1773_v25  ;;  %v1580_v13 = vpop.f32.mrb[12].mxu0  ;;  %v1766_v42 = vmul.f32 %v2504_v36, %v1644_v35 }
 0x3ca   : > { %v2506_v38 = vpop.eup %2505  ;;  %2523 = vrcp.f32 %v1697_v33  ;;  %v1582_v45 = vpop.f32.mrb[13].mxu0  ;;  %v1647_v53 = vadd.f32 %v3374_v43, %v1580_v13 }
 0x3cb   : > { %2525 = vpow2.f32 %v2050_v24  ;;  %v1648_v46 = vadd.f32 %v3369_v62, %v1582_v45  ;;  %v2508_v47 = vpop.eup %2507  ;;  %v1774_v50 = vadd.f32 %v1766_v42, %v1643_v41  ;;  %v1699_v52 = vadd.f32 1.0, %v2506_v38 }
 0x3cc   : > { %2527 = vrcp.f32 %v1743_v27  ;;  %v2510_v51 = vpop.eup %2509 }
 0x3cd   : > { %2529 = vpow2.f32 %v2051_v37  ;;  %v1767_v54 = vmul.f32 %v2508_v47, %v1648_v46  ;;  %v1586_v55 = vpop.f32.mrb[14].mxu0  ;;  %v1745_v3 = vadd.f32 1.0, %v2510_v51 }
 0x3ce   : > { %v2512_v56 = vpop.eup %2511  ;;  %2531 = vrcp.f32 %v1698_v40  ;;  %v1588_v57 = vpop.f32.mrb[15].mxu0  ;;  %v1651_v61 = vadd.f32 %v3374_v43, %v1586_v55 }
 0x3cf   : > { %v2514_v58 = vpop.eup %2513  ;;  %2533 = vtanh.f32 %v1774_v50  ;;  %v1775_v59 = vadd.f32 %v1767_v54, %v1647_v53  ;;  %v1652_v60 = vadd.f32 %v3369_v62, %v1588_v57  ;;  %v1700_v6 = vadd.f32 1.0, %v2512_v56 }
 0x3d0   : > { %v2516_v1 = vpop.eup %2515  ;;  %2535 = vrcp.f32 %v1744_v48  ;;  %v1789_v10 = vsub.f32 1.0, %v2514_v58  ;;  %v1805_v63 = vmul.f32 %v2514_v58, %v3148_v26 }
 0x3d1   : > { %v2518_v5 = vpop.eup %2517  ;;  %2537 = vrcp.f32 %v1699_v52  ;;  %v1768_v7 = vmul.f32 %v2516_v1, %v1652_v60  ;;  %v1592_v8 = vpop.f32.mrb[16].mxu0 }
 0x3d2   : > { %v2520_v9 = vpop.eup %2519  ;;  %2539 = vtanh.f32 %v1775_v59  ;;  %v1594_v11 = vpop.f32.mrb[17].mxu0  ;;  %v1746_v44 = vadd.f32 1.0, %v2518_v5  ;;  %v1655_v16 = vadd.f32 %v3374_v43, %v1592_v8  ;;  %v2561_v8 = vld [vmem:[#allocation12 + $0x20] sm:$0xff] }
 0x3d3   : > { %v2522_v2 = vpop.eup %2521  ;;  %v1776_v12 = vadd.f32 %v1768_v7, %v1651_v61  ;;  %v1656_v14 = vadd.f32 %v3369_v62, %v1594_v11  ;;  %2541 = vrcp.f32 %v1745_v3  ;;  %v1790_v33 = vsub.f32 1.0, %v2520_v9 }
 0x3d4   : > { %v2524_v39 = vpop.eup %2523  ;;  %v1797_v49 = vmul.f32 %v2522_v2, %v1789_v10  ;;  %2543 = vrcp.f32 %v1700_v6  ;;  %v1806_v27 = vmul.f32 %v2520_v9, %v3153_v28 }
 0x3d5   : > { %v2526_v31 = vpop.eup %2525  ;;  %v1769_v17 = vmul.f32 %v2524_v39, %v1656_v14  ;;  %v1598_v18 = vpop.f32.mrb[18].mxu0  ;;  %2545 = vtanh.f32 %v1776_v12  ;;  %v2562_v12 = vld [vmem:[#allocation12 + $0x28] sm:$0xff] }
 0x3d6   : > { %v2528_v4 = vpop.eup %2527  ;;  %v1813_v32 = vadd.f32 %v1805_v63, %v1797_v49  ;;  %v1600_v0 = vpop.f32.mrb[19].mxu0  ;;  %2547 = vrcp.f32 %v1746_v44  ;;  %v1747_v26 = vadd.f32 1.0, %v2526_v31  ;;  %v1659_v23 = vadd.f32 %v3374_v43, %v1598_v18  ;;  %v2563_v31 = vld [vmem:[#allocation12 + $0x30] sm:$0xff] }
 0x3d7   : > { %v2530_v19 = vpop.eup %2529  ;;  %v1777_v15 = vadd.f32 %v1769_v17, %v1655_v16  ;;  %v1660_v20 = vadd.f32 %v3369_v62, %v1600_v0  ;;  %v1791_v13 = vsub.f32 1.0, %v2528_v4  ;;  %v1807_v42 = vmul.f32 %v2528_v4, %v3158_v29  ;;  %v2564_v0 = vld [vmem:[#allocation12 + $0x38] sm:$0xff] }
 0x3d8   : > { %v2532_v21 = vpop.eup %2531  ;;  %1821 = vst [vmem:[#allocation12] sm:$0xff] %v1813_v32  ;;  %v1748_v45 = vadd.f32 1.0, %v2530_v19 }
 0x3d9   : > { %v2534_v22 = vpop.eup %2533  ;;  %2549 = vtanh.f32 %v1777_v15  ;;  %v1770_v24 = vmul.f32 %v2532_v21, %v1660_v20  ;;  %v1604_v25 = vpop.f32.mrb[20].mxu0 }
 0x3da   : > { %v2536_v34 = vpop.eup %2535  ;;  %v1798_v35 = vmul.f32 %v2534_v22, %v1790_v33  ;;  %v1606_v36 = vpop.f32.mrb[21].mxu0  ;;  %2551 = vrcp.f32 %v1747_v26  ;;  %v1663_v48 = vadd.f32 %v3374_v43, %v1604_v25 }
 0x3db   : > { %v2538_v37 = vpop.eup %2537  ;;  %v1778_v38 = vadd.f32 %v1770_v24, %v1659_v23  ;;  %v1664_v40 = vadd.f32 %v3369_v62, %v1606_v36  ;;  %v1792_v54 = vsub.f32 1.0, %v2536_v34  ;;  %v1808_v29 = vmul.f32 %v2536_v34, %v3163_v30 }
 0x3dc   : > { %v2540_v41 = vpop.eup %2539  ;;  %v1814_v46 = vadd.f32 %v1806_v27, %v1798_v35 }
 0x3dd   : > { %v1799_v47 = vmul.f32 %v2540_v41, %v1791_v13  ;;  %2553 = vtanh.f32 %v1778_v38  ;;  %v1771_v50 = vmul.f32 %v2538_v37, %v1664_v40  ;;  %v1610_v51 = vpop.f32.mrb[22].mxu0  ;;  %v2542_v28 = vpop.eup %2541 }
 0x3de   : > { %1822 = vst [vmem:[#allocation12 + $0x8] sm:$0xff] %v1814_v46  ;;  %v1612_v52 = vpop.f32.mrb[23].mxu0  ;;  %v2544_v53 = vpop.eup %2543  ;;  %2555 = vrcp.f32 %v1748_v45  ;;  %v1667_v60 = vadd.f32 %v3374_v43, %v1610_v51  ;;  %v1793_v5 = vsub.f32 1.0, %v2542_v28  ;;  %v1809_v9 = vmul.f32 %v2561_v8, %v2542_v28 }
 0x3df   : > { %v1815_v55 = vadd.f32 %v1807_v42, %v1799_v47  ;;  %v1779_v56 = vadd.f32 %v1771_v50, %v1663_v48  ;;  %v1668_v57 = vadd.f32 %v3369_v62, %v1612_v52  ;;  %v2546_v58 = vpop.eup %2545 }
 0x3e0   : > { %v1800_v59 = vmul.f32 %v2546_v58, %v1792_v54  ;;  %v2548_v3 = vpop.eup %2547 }
 0x3e1   : > { %1823 = vst [vmem:[#allocation12 + $0x10] sm:$0xff] %v1815_v55  ;;  %2557 = vtanh.f32 %v1779_v56  ;;  %v1772_v1 = vmul.f32 %v2544_v53, %v1668_v57  ;;  %v1794_v11 = vsub.f32 1.0, %v2548_v3  ;;  %v1810_v14 = vmul.f32 %v2562_v12, %v2548_v3 }
 0x3e2   : > { %v1816_v61 = vadd.f32 %v1808_v29, %v1800_v59 }
 0x3e3   : > { %v2550_v6 = vpop.eup %2549  ;;  %v1780_v7 = vadd.f32 %v1772_v1, %v1667_v60 }
 0x3e4   : > { %v1801_v10 = vmul.f32 %v2550_v6, %v1793_v5  ;;  %1824 = vst [vmem:[#allocation12 + $0x18] sm:$0xff] %v1816_v61  ;;  %v2552_v62 = vpop.eup %2551 }
 0x3e5   : > { %2559 = vtanh.f32 %v1780_v7  ;;  %v1795_v63 = vsub.f32 1.0, %v2552_v62  ;;  %v1811_v16 = vmul.f32 %v2563_v31, %v2552_v62 }
 0x3e6   : > { %v1817_v30 = vadd.f32 %v1809_v9, %v1801_v10 }
 0x3e7   : > { %v2554_v2 = vpop.eup %2553 }
 0x3e8   : > { %1825 = vst [vmem:[#allocation12 + $0x20] sm:$0xff] %v1817_v30  ;;  %v1802_v39 = vmul.f32 %v2554_v2, %v1794_v11  ;;  %v2556_v43 = vpop.eup %2555 }
 0x3e9   : > { %v1796_v18 = vsub.f32 1.0, %v2556_v43  ;;  %v1812_v19 = vmul.f32 %v2564_v0, %v2556_v43 }
 0x3ea   : > { %v1818_v44 = vadd.f32 %v1810_v14, %v1802_v39 }
 0x3eb   : > { %v2558_v49 = vpop.eup %2557 }
 0x3ec   : > { %1826 = vst [vmem:[#allocation12 + $0x28] sm:$0xff] %v1818_v44  ;;  %v1803_v17 = vmul.f32 %v2558_v49, %v1795_v63 }
 0x3ee   : > { %v1819_v4 = vadd.f32 %v1811_v16, %v1803_v17 }
 0x3ef   : > { %v2560_v32 = vpop.eup %2559 }
 0x3f0   : > { %1827 = vst [vmem:[#allocation12 + $0x30] sm:$0xff] %v1819_v4  ;;  %v1804_v15 = vmul.f32 %v2560_v32, %v1796_v18 }
 0x3f2   : > { %v1820_v20 = vadd.f32 %v1812_v19, %v1804_v15 }
 0x3f4   : > { %1828 = vst [vmem:[#allocation12 + $0x38] sm:$0xff] %v1820_v20 }
 0x3f5   : > { %2750 = shalt.err (!%p2747_p0)
}
 0x3f6   : > { %s2751_s0 = scalar_lea.hbm %s3441_s7, 1024 }
 0x3f7   : > { %p2752_p11 = scmp.ne.s32.totalorder %s3441_s7, %s2751_s0  ;;  %p2757_p1 = scmp.lt.u32.totalorder %s2751_s0, %s3441_s7 }
 0x3f9   : > { %p2753_p3 = pnand %p2752_p11, %p2433_p2 }
 0x3fb   : > { %p2754_p7 = pneg %p2753_p3 }
 0x3fd   : > { %p2759_p10 = pnand %p2757_p1, %p2754_p7 }
 0x3ff   : > { %2762 = shalt.err (!%p2759_p10)
}
 0x400   : > { %s2833_s23 = smov 128   ;;  %s2834_s20 = smov 8  }
 0x401   : > { %2401 = dma.vmem_to_hbm [thread:$0]  (%p2433_p2), %s1836_s15, 1024, %s3441_s7, [#allocation4], %s2833_s23, %s2833_s23, %s2834_s20  }
 0x402   : > { %2800 = dma.done.wait (%p2433_p2), [#allocation4], 1024  }
 0x403   : > { %2802 = vsyncadd (%p2433_p2), [#allocation4], 4294966272 }
 0x404 PF: > { %s3486_s27 = sld [smem:[#allocation19_spill]]  ;;  %s3487_s19 = sld [smem:[#allocation20_spill]] }
 0x405   : > { %s3488_s24 = smov %s2809_s25  ;;  %s3489_s25 = smov %s2813_s26 }
 0x40a   : > { %p18_p13 = scmp.ge.s32.totalorder %s3486_s27, 4   ;;  %s3490_s26 = smov %s3487_s19 }
 0x40c   :  { %20 = sbr.rel (!%p18_p13) target bundleno = 9 (0x9), region = 117 }
 0x413   :  { %1851 = vsyncpa [#allocation3], 1 }
 0x414   :  { %1853 = vsyncpa [#allocation3 + $0x1], 1 }
 0x415   :  { %1854 = vsyncpa [#allocation6], 1 }
 0x416   :  { %1855 = vsyncpa [#allocation11], 1 }
 0x417   :  { %1856 = vsyncpa [#allocation4], 1 }
 0x418   :  { %1858 = vsyncpa [#allocation4 + $0x1], 1 }

</bundles_post_ra>
